<compile_context>
chip_gen: v6e
topology: v6e:2x2x1
jax: 0.10.0
libtpu: 0.0.40
codegen_flags: <defaults>
</compile_context>

<pallas_src>
import functools

import jax
import jax.numpy as jnp
from jax.experimental import pallas as pl
from jax.experimental.pallas import tpu as pltpu

EMB = 768                 # embedding_dim
HID = 512                 # hidden_dim
RAGA_VOCAB = 50
STYLE_VOCAB = 20
LN_EPS = 1e-5             # PyTorch LayerNorm default
MAX_TB = 256              # max rows per grid step (safe on v5e's 16 MiB scoped VMEM)
MEGACORE_MIN_ROWS = 128   # split into >=2 tiles above this so v7x cores both work


def _round_up(n, m):
    return ((n + m - 1) // m) * m


@functools.lru_cache(maxsize=1)
def _buffered_once_supported() -> bool:
    """Probe once whether pipeline_mode=pl.Buffered(1) (single-buffered resident
    inputs) lowers/compiles/runs correctly on this JAX build; fall back if not."""
    try:
        def k(x_ref, o_ref):
            o_ref[...] = x_ref[...] * 2.0

        f = pl.pallas_call(
            k,
            out_shape=jax.ShapeDtypeStruct((16, 128), jnp.float32),
            grid=(2,),
            in_specs=[pl.BlockSpec((8, 128), lambda i: (0, 0),
                                   pipeline_mode=pl.Buffered(1))],
            out_specs=pl.BlockSpec((8, 128), lambda i: (i, 0)),
        )
        y = jax.block_until_ready(jax.jit(f)(jnp.ones((8, 128), jnp.float32)))
        return bool(jnp.allclose(y, 2.0))
    except Exception:   # any lowering / compile / runtime rejection -> double buffer
        return False


# ----------------------------------------------------------------------------
# Kernel: one grid step processes a [TB] slice of the batch.
#   x_ref    : [TB, 512]  bf16  pre-activation of fusion layer 1 (W1 already folded
#                               into the embedding tables; b1 folded in too)
#   w2_ref   : [512, 768] bf16  Linear(512->768) weight, pre-transposed, resident
#   rows_ref : [2, 768]   f32   row 0 = b2, row 1 = fused attention bias
#   wa_ref   : [768, 768] bf16  fused diag(gamma) @ Wv^T @ Wo^T, resident
#   out_ref  : [TB, 768]  bf16
# ----------------------------------------------------------------------------
def cultural_kernel(x_ref, w2_ref, rows_ref, wa_ref, out_ref):
    rows = rows_ref[...]                                            # [2, 768] f32

    # ---- fusion_network: ReLU (Linear1 + b1 already folded into the input) ----
    h = jnp.maximum(x_ref[...], 0.0)                                # [TB, 512] bf16
    # (Dropout p=0.1 is identity in eval mode.)

    # ---- Linear(512->768) ----
    y = jnp.dot(h, w2_ref[...], preferred_element_type=jnp.float32) + rows[0:1, :]

    # ---- LayerNorm(768); affine folded into the attention matmul ----
    mean = jnp.mean(y, axis=-1, keepdims=True)
    centered = y - mean
    var = jnp.mean(centered * centered, axis=-1, keepdims=True)
    yn = centered * jax.lax.rsqrt(var + LN_EPS)

    # ---- MultiheadAttention(768, 8) with seq_len == 1 (softmax == 1) ----
    out = jnp.dot(yn.astype(jnp.bfloat16), wa_ref[...],
                  preferred_element_type=jnp.float32) + rows[1:2, :]

    out_ref[...] = out.astype(out_ref.dtype)


# ----------------------------------------------------------------------------
# Parameters (PyTorch-native layout) + one-time kernel prep
# ----------------------------------------------------------------------------
def init_params(key):
    ks = jax.random.split(key, 10)
    s = 0.02
    return {
        "raga_table":  jax.random.normal(ks[0], (RAGA_VOCAB, EMB // 2), jnp.float32) * s,
        "style_table": jax.random.normal(ks[1], (STYLE_VOCAB, EMB // 2), jnp.float32) * s,
        "w1": jax.random.normal(ks[2], (HID, EMB), jnp.float32) * s,   # Linear(768->512).weight
        "b1": jax.random.normal(ks[3], (HID,), jnp.float32) * s,
        "w2": jax.random.normal(ks[4], (EMB, HID), jnp.float32) * s,   # Linear(512->768).weight
        "b2": jax.random.normal(ks[5], (EMB,), jnp.float32) * s,
        "ln_gamma": jnp.ones((EMB,), jnp.float32),
        "ln_beta":  jnp.zeros((EMB,), jnp.float32),
        # MHA in_proj is [3*E, E]; only the V slice affects the output when seq_len == 1.
        "in_proj_w": jax.random.normal(ks[6], (3 * EMB, EMB), jnp.float32) * s,
        "in_proj_b": jax.random.normal(ks[7], (3 * EMB,), jnp.float32) * s,
        "wo": jax.random.normal(ks[8], (EMB, EMB), jnp.float32) * s,   # out_proj.weight
        "bo": jax.random.normal(ks[9], (EMB,), jnp.float32) * s,
    }


def prepare_kernel_params(params):
    """One-time transform: fold Linear1 (+ b1) into the embedding tables, fuse the
    attention V/out projections with the LN affine, pre-transpose, cast to bf16."""
    half = EMB // 2
    w1_t = params["w1"].T                                           # [768, 512]

    # Fold Linear(768->512) + b1 into the embedding tables (f32, exact).
    raga_proj = params["raga_table"] @ w1_t[:half, :] + params["b1"][None, :]   # [50, 512]
    style_proj = params["style_table"] @ w1_t[half:, :]                          # [20, 512]

    # Fuse attention V proj -> out proj, then fold the LayerNorm affine (f32).
    wv_t = params["in_proj_w"][2 * EMB:, :].T                       # [768, 768]
    bv = params["in_proj_b"][2 * EMB:]
    wo_t = params["wo"].T                                           # [768, 768]
    w_attn = wv_t @ wo_t                                            # [768, 768]
    b_attn = bv @ wo_t + params["bo"]                               # [768]
    w_attn_folded = params["ln_gamma"][:, None] * w_attn            # diag(gamma) @ W
    b_attn_folded = params["ln_beta"] @ w_attn + b_attn             # beta @ W + b

    return {
        "raga_proj":  raga_proj.astype(jnp.float32),
        "style_proj": style_proj.astype(jnp.float32),
        "w2_t":   params["w2"].T.astype(jnp.bfloat16),              # [512, 768]
        "rows":   jnp.stack([params["b2"], b_attn_folded], axis=0).astype(jnp.float32),
        "w_attn": w_attn_folded.astype(jnp.bfloat16),               # [768, 768]
    }


# ----------------------------------------------------------------------------
# Forward
# ----------------------------------------------------------------------------
@functools.partial(jax.jit, static_argnames=("single_buffer_weights",))
def _forward_impl(kp, raga_ids, style_ids, single_buffer_weights):
    # Embedding gather on the W1-folded tables (tiny XLA glue; f32 sum, one bf16 cast).
    # TODO(synk): for the tiny-batch serving path this gather could be moved in-kernel
    # via PrefetchScalarGridSpec; left as glue since it is not the bottleneck here.
    h_pre = (jnp.take(kp["raga_proj"], raga_ids, axis=0)
             + jnp.take(kp["style_proj"], style_ids, axis=0))       # [B, 512] f32
    B = h_pre.shape[0]

    # Balanced tiling: number of tiles first, then a 16-row-aligned tile size
    # (full bf16 vreg packing); >=2 tiles above the threshold so v7x megacore shards.
    n_tiles = pl.cdiv(B, MAX_TB)
    if B >= MEGACORE_MIN_ROWS:
        n_tiles = max(n_tiles, 2)
    tb = _round_up(pl.cdiv(B, n_tiles), 16)
    padded_b = n_tiles * tb
    if padded_b != B:
        h_pre = jnp.pad(h_pre, ((0, padded_b - B), (0, 0)))
    x = h_pre.astype(jnp.bfloat16)

    # Resident weights: constant block index -> fetched once; single-buffer if supported.
    resident = {"pipeline_mode": pl.Buffered(1)} if single_buffer_weights else {}

    cost = pl.CostEstimate(
        flops=2 * padded_b * (HID * EMB + EMB * EMB),
        transcendentals=padded_b,                       # one rsqrt per row
        bytes_accessed=(padded_b * HID * 2              # x in (bf16)
                        + padded_b * EMB * 2            # out (bf16)
                        + HID * EMB * 2                 # w2
                        + EMB * EMB * 2                 # fused attention weight
                        + 2 * EMB * 4),                 # bias rows
    )

    out = pl.pallas_call(
        cultural_kernel,
        out_shape=jax.ShapeDtypeStruct((padded_b, EMB), jnp.bfloat16),
        grid=(n_tiles,),
        in_specs=[
            pl.BlockSpec((tb, HID), lambda i: (i, 0)),                # activations: tiled
            pl.BlockSpec((HID, EMB), lambda i: (0, 0), **resident),   # w2: resident
            pl.BlockSpec((2, EMB), lambda i: (0, 0), **resident),     # bias rows: resident
            pl.BlockSpec((EMB, EMB), lambda i: (0, 0), **resident),   # fused attn W: resident
        ],
        out_specs=pl.BlockSpec((tb, EMB), lambda i: (i, 0)),
        compiler_params=pltpu.CompilerParams(
            dimension_semantics=("parallel",),
            vmem_limit_bytes=32 * 1024 * 1024,
        ),
        cost_estimate=cost,
    )(x, kp["w2_t"], kp["rows"], kp["w_attn"])

    return out[:B]


def cultural_conditioning_forward(kp, raga_ids, style_ids):
    return _forward_impl(kp, raga_ids, style_ids, _buffered_once_supported())


# ----------------------------------------------------------------------------
# Pure-JAX reference (original, unfused math; eval mode) for a tolerance check.
# ----------------------------------------------------------------------------
def reference_forward(params, raga_ids, style_ids):
    raga_emb = params["raga_table"][raga_ids]
    style_emb = params["style_table"][style_ids]
    x = jnp.concatenate([raga_emb, style_emb], axis=-1)             # [B, 768]
    h = jax.nn.relu(x @ params["w1"].T + params["b1"])              # Dropout = identity (eval)
    y = h @ params["w2"].T + params["b2"]
    mean = y.mean(-1, keepdims=True)
    var = ((y - mean) ** 2).mean(-1, keepdims=True)
    z = (y - mean) / jnp.sqrt(var + LN_EPS) * params["ln_gamma"] + params["ln_beta"]
    # MHA with seq_len == 1: softmax over a single key == 1 -> V path then out proj.
    v = z @ params["in_proj_w"][2 * EMB:].T + params["in_proj_b"][2 * EMB:]
    return v @ params["wo"].T + params["bo"]


if __name__ == "__main__":
    root = jax.random.PRNGKey(0)
    pkey, ikey = jax.random.split(root)

    params = init_params(pkey)
    kernel_params = prepare_kernel_params(params)   # one-time fold / transpose / bf16

    B = 2
    k1, k2 = jax.random.split(ikey)
    raga_ids = jax.random.randint(k1, (B,), 0, RAGA_VOCAB, dtype=jnp.int32)
    style_ids = jax.random.randint(k2, (B,), 0, STYLE_VOCAB, dtype=jnp.int32)

    out = cultural_conditioning_forward(kernel_params, raga_ids, style_ids)
    out = jax.block_until_ready(out)

    assert out.shape == (B, EMB), out.shape
    out_f32 = out.astype(jnp.float32)
    assert bool(jnp.all(jnp.isfinite(out_f32)))

    ref = reference_forward(params, raga_ids, style_ids)
    max_err = float(jnp.max(jnp.abs(out_f32 - ref)))
    assert bool(jnp.allclose(out_f32, ref, atol=3e-2, rtol=3e-2)), f"max_err={max_err}"

    print("KERNEL_OK")
</pallas_src>

<mosaic_0001>
module attributes {stable_mosaic.version = 11 : i64} {
  func.func @k(%arg0: i32, %arg1: memref<8x128xf32, #tpu.memory_space<vmem>>, %arg2: memref<8x128xf32, #tpu.memory_space<vmem>>) attributes {dimension_semantics = [#tpu.dimension_semantics<arbitrary>], iteration_bounds = array<i64: 2>, scalar_prefetch = 0 : i64, scratch_operands = 0 : i64, tpu.core_type = #tpu.core_type<tc>, window_params = [{pipeline_mode = #tpu.pipeline_mode<synchronous>, transform_indices = @transform_0, window_bounds = array<i64: 8, 128>}, {transform_indices = @transform_1, window_bounds = array<i64: 8, 128>}]} {
    %c0 = arith.constant 0 : index
    %c0_0 = arith.constant 0 : index
    %0 = vector.load %arg1[%c0, %c0_0] : memref<8x128xf32, #tpu.memory_space<vmem>>, vector<8x128xf32>
    %cst = arith.constant 2.000000e+00 : f32
    %1 = vector.broadcast %cst : f32 to vector<8x128xf32>
    %2 = arith.mulf %0, %1 : vector<8x128xf32>
    %c0_1 = arith.constant 0 : index
    %c0_2 = arith.constant 0 : index
    %3 = vector.load %arg2[%c0_1, %c0_2] : memref<8x128xf32, #tpu.memory_space<vmem>>, vector<8x128xf32>
    tpu.vector_store %arg2[%c0_1, %c0_2], %2 {strides = array<i32>} : memref<8x128xf32, #tpu.memory_space<vmem>>, vector<8x128xf32>,
    return
  }
  func.func @transform_0(%arg0: i32) -> (i32, i32) {
    %c0_i32 = arith.constant 0 : i32
    %c0_i32_0 = arith.constant 0 : i32
    %c0_i32_1 = arith.constant 0 : i32
    return %c0_i32, %c0_i32_0 : i32, i32
  }
  func.func @transform_1(%arg0: i32) -> (i32, i32) {
    %c0_i32 = arith.constant 0 : i32
    %c0_i32_0 = arith.constant 0 : i32
    return %arg0, %c0_i32 : i32, i32
  }
}

module attributes {stable_mosaic.version = 11 : i64} {
  func.func @cultural_kernel(%arg0: i32, %arg1: memref<16x512xbf16, #tpu.memory_space<vmem>>, %arg2: memref<512x768xbf16, #tpu.memory_space<vmem>>, %arg3: memref<2x768xf32, #tpu.memory_space<vmem>>, %arg4: memref<768x768xbf16, #tpu.memory_space<vmem>>, %arg5: memref<16x768xbf16, #tpu.memory_space<vmem>>) attributes {dimension_semantics = [#tpu.dimension_semantics<parallel>], iteration_bounds = array<i64: 1>, scalar_prefetch = 0 : i64, scratch_operands = 0 : i64, tpu.core_type = #tpu.core_type<tc>, window_params = [{transform_indices = @transform_0, window_bounds = array<i64: 16, 512>}, {pipeline_mode = #tpu.pipeline_mode<synchronous>, transform_indices = @transform_1, window_bounds = array<i64: 512, 768>}, {pipeline_mode = #tpu.pipeline_mode<synchronous>, transform_indices = @transform_2, window_bounds = array<i64: 2, 768>}, {pipeline_mode = #tpu.pipeline_mode<synchronous>, transform_indices = @transform_3, window_bounds = array<i64: 768, 768>}, {transform_indices = @transform_4, window_bounds = array<i64: 16, 768>}]} {
    %c0 = arith.constant 0 : index
    %c0_0 = arith.constant 0 : index
    %0 = vector.load %arg3[%c0, %c0_0] : memref<2x768xf32, #tpu.memory_space<vmem>>, vector<2x768xf32>
    %c0_1 = arith.constant 0 : index
    %c0_2 = arith.constant 0 : index
    %1 = vector.load %arg1[%c0_1, %c0_2] : memref<16x512xbf16, #tpu.memory_space<vmem>>, vector<16x512xbf16>
    %cst = arith.constant 0.000000e+00 : bf16
    %2 = vector.broadcast %cst : bf16 to vector<16x512xbf16>
    %3 = arith.maximumf %1, %2 : vector<16x512xbf16>
    %c0_3 = arith.constant 0 : index
    %c0_4 = arith.constant 0 : index
    %4 = vector.load %arg2[%c0_3, %c0_4] : memref<512x768xbf16, #tpu.memory_space<vmem>>, vector<512x768xbf16>
    %cst_5 = arith.constant dense<0.000000e+00> : vector<16x768xf32>
    %5 = tpu.matmul %3, %4, %cst_5 {dimension_numbers = #tpu.dot_dimension_numbers<[1], [0], [0], [1], [0, 0, 1, 1], [], []>} : vector<16x512xbf16>, vector<512x768xbf16>, vector<16x768xf32> -> vector<16x768xf32>
    %6 = vector.extract_strided_slice %0 {offsets = [0, 0], sizes = [1, 768], strides = [1, 1]} : vector<2x768xf32> to vector<1x768xf32>
    %7 = vector.broadcast %6 : vector<1x768xf32> to vector<16x768xf32>
    %8 = arith.addf %5, %7 : vector<16x768xf32>
    %cst_6 = arith.constant dense<0.000000e+00> : vector<16xf32>
    %9 = vector.multi_reduction <add>, %8, %cst_6 [1] : vector<16x768xf32> to vector<16xf32>
    %10 = vector.shape_cast %9 : vector<16xf32> to vector<16x1xf32>
    %cst_7 = arith.constant 7.680000e+02 : f32
    %11 = vector.broadcast %cst_7 : f32 to vector<16x1xf32>
    %12 = arith.divf %10, %11 : vector<16x1xf32>
    %13 = vector.broadcast %12 : vector<16x1xf32> to vector<16x768xf32>
    %14 = arith.subf %8, %13 : vector<16x768xf32>
    %15 = arith.mulf %14, %14 : vector<16x768xf32>
    %cst_8 = arith.constant dense<0.000000e+00> : vector<16xf32>
    %16 = vector.multi_reduction <add>, %15, %cst_8 [1] : vector<16x768xf32> to vector<16xf32>
    %17 = vector.shape_cast %16 : vector<16xf32> to vector<16x1xf32>
    %cst_9 = arith.constant 7.680000e+02 : f32
    %18 = vector.broadcast %cst_9 : f32 to vector<16x1xf32>
    %19 = arith.divf %17, %18 : vector<16x1xf32>
    %cst_10 = arith.constant 9.99999974E-6 : f32
    %20 = vector.broadcast %cst_10 : f32 to vector<16x1xf32>
    %21 = arith.addf %19, %20 : vector<16x1xf32>
    %22 = math.rsqrt %21 : vector<16x1xf32>
    %23 = vector.broadcast %22 : vector<16x1xf32> to vector<16x768xf32>
    %24 = arith.mulf %14, %23 : vector<16x768xf32>
    %25 = arith.truncf %24 : vector<16x768xf32> to vector<16x768xbf16>
    %c0_11 = arith.constant 0 : index
    %c0_12 = arith.constant 0 : index
    %26 = vector.load %arg4[%c0_11, %c0_12] : memref<768x768xbf16, #tpu.memory_space<vmem>>, vector<768x768xbf16>
    %cst_13 = arith.constant dense<0.000000e+00> : vector<16x768xf32>
    %27 = tpu.matmul %25, %26, %cst_13 {dimension_numbers = #tpu.dot_dimension_numbers<[1], [0], [0], [1], [0, 0, 1, 1], [], []>} : vector<16x768xbf16>, vector<768x768xbf16>, vector<16x768xf32> -> vector<16x768xf32>
    %28 = vector.extract_strided_slice %0 {offsets = [1, 0], sizes = [1, 768], strides = [1, 1]} : vector<2x768xf32> to vector<1x768xf32>
    %29 = vector.broadcast %28 : vector<1x768xf32> to vector<16x768xf32>
    %30 = arith.addf %27, %29 : vector<16x768xf32>
    %31 = arith.truncf %30 : vector<16x768xf32> to vector<16x768xbf16>
    %c0_14 = arith.constant 0 : index
    %c0_15 = arith.constant 0 : index
    %32 = vector.load %arg5[%c0_14, %c0_15] : memref<16x768xbf16, #tpu.memory_space<vmem>>, vector<16x768xbf16>
    tpu.vector_store %arg5[%c0_14, %c0_15], %31 {strides = array<i32>} : memref<16x768xbf16, #tpu.memory_space<vmem>>, vector<16x768xbf16>,
    return
  }
  func.func @transform_0(%arg0: i32) -> (i32, i32) {
    %c0_i32 = arith.constant 0 : i32
    %c0_i32_0 = arith.constant 0 : i32
    return %arg0, %c0_i32 : i32, i32
  }
  func.func @transform_1(%arg0: i32) -> (i32, i32) {
    %c0_i32 = arith.constant 0 : i32
    %c0_i32_0 = arith.constant 0 : i32
    %c0_i32_1 = arith.constant 0 : i32
    return %c0_i32, %c0_i32_0 : i32, i32
  }
  func.func @transform_2(%arg0: i32) -> (i32, i32) {
    %c0_i32 = arith.constant 0 : i32
    %c0_i32_0 = arith.constant 0 : i32
    %c0_i32_1 = arith.constant 0 : i32
    return %c0_i32, %c0_i32_0 : i32, i32
  }
  func.func @transform_3(%arg0: i32) -> (i32, i32) {
    %c0_i32 = arith.constant 0 : i32
    %c0_i32_0 = arith.constant 0 : i32
    %c0_i32_1 = arith.constant 0 : i32
    return %c0_i32, %c0_i32_0 : i32, i32
  }
  func.func @transform_4(%arg0: i32) -> (i32, i32) {
    %c0_i32 = arith.constant 0 : i32
    %c0_i32_0 = arith.constant 0 : i32
    return %arg0, %c0_i32 : i32, i32
  }
}

</mosaic_0001>

<bundles_post_ra>
// kernel: tpu_custom_call.1
= control target key start
LH: loop header
LB: loop body
LE: loop exit
PB: predicated region body
PF: predicated region fallthrough
CT: control target
= control target key end

     0   :  { %6 = vsyncpa [#allocation3], 0  ;;  %s448_s0 = inlined_call_operand.hbm [shape: f32[8,128], index: 0, kind: input, shape index: {}]   ;;  %s449_s1 = inlined_call_operand.hbm [shape: f32[16,128], index: 1, kind: output, shape index: {}]  }
   0x1   :  { %7 = vsyncpa [#allocation4], 0 }
   0x2   :  { %9 = vsyncpa [#allocation4 + $0x1], 0  ;;  %s348_s6 = smov 0   ;;  %s350_s7 = smov 0  }
   0x3   :  { %s352_s8 = smov 0   ;;  %s354_s9 = smov 0  }
   0x4 LB: > { %s369_s10 = sadd.s32 4294967295, %s334_s9   ;;  %s184_s11 = sadd.s32 4294967294, %s334_s9   ;;  %s334_s9 = sphi %s354_s9, %s457_s9   ;;  %s330_s8 = sphi %s352_s8, %s456_s8   ;;  %s326_s7 = sphi %s350_s7, %s455_s7   ;;  %s322_s6 = sphi %s348_s6, %s454_s6  }
   0x5   : > { %s373_s12 = sadd.s32 1, %s334_s9   ;;  %s43_s13 = sadd.s32 1, %s330_s8 }
   0x6   : > { %s40_s14 = ssub.s32 %s334_s9, %s373_s12  ;;  %p53_p0 = scmp.ne.s32.totalorder %s330_s8, %s326_s7 }
   0x7   : > { %p41_p1 = scmp.eq.s32.totalorder %s40_s14, 0  ;;  %p54_p2 = scmp.eq.s32.totalorder %s369_s10, 1 }
   0x8   : > { %p59_p3 = scmp.ne.s32.totalorder %s326_s7, %s322_s6  ;;  %p60_p4 = scmp.eq.s32.totalorder %s184_s11, 1 }
   0x9   : > { %s384_s15 = scalar_select %p41_p1, %s330_s8, %s43_s13  }
   0xa   : > { %p386_p5 = por %p54_p2, %p53_p0  ;;  %p390_p6 = por %p60_p4, %p59_p3 }
   0xb   : > { %p185_p7 = scmp.ge.s32.totalorder %s334_s9, 1  ;;  %p67_p8 = scmp.lt.s32.totalorder %s334_s9, 3 }
   0xc   : > { %s451_s17 = scalar_select %p390_p6, 1, 0 }
   0xd   : > { %p208_p9 = scmp.eq.s32.totalorder %s369_s10, 0  ;;  %p397_p10 = pnand %p185_p7, %p67_p8 }
   0xe   : > { %s336_s19 = smov [#allocation2]  }
   0xf   : > { %s80_s20 = sshll.u32 %s336_s19, 4  ;;  %p200_p11 = pneg %p397_p10  ;;  %s81_s20 = int_to_ptr.vmem [resolvable:$true] %s80_s20 }
  0x10   : > { %s255_s21 = scalar_lea.vmem %s81_s20, 128  ;;  %p263_p3 = scmp.lt.s32.totalorder %s81_s20, %s81_s20 }
  0x11   : > { %p201_p12 = pnand %p208_p9, %p200_p11  ;;  %p256_p0 = scmp.ne.s32.totalorder %s81_s20, %s255_s21 }
  0x12   : > { %p264_p4 = scmp.lt.s32.totalorder %s255_s21, %s255_s21 }
  0x13   : > { %p246_p13 = pneg %p201_p12 }
  0x14   : > { %p265_p6 = por %p264_p4, %p263_p3 }
  0x15   : > { %p258_p1 = pnand %p256_p0, %p246_p13 }
  0x17   : > { %p259_p2 = pneg %p258_p1 }
  0x19   : > { %p266_p7 = pnand %p265_p6, %p259_p2 }
  0x1b   : > { %269 = shalt.err (!%p266_p7)
}
  0x1c   : > { %203 = dma.hbm_to_vmem [thread:$0]  (!%p201_p12), %s448_s0, 128, %s81_s20, [#allocation3]  }
  0x1d   : > { %93 = sbr.rel (%p397_p10) target bundleno = 60 (0x3c), region = 24 }
  0x22   : > { %313 = dma.done.wait (%p208_p9), [#allocation3], 128  }
  0x23   : > { %315 = vsyncadd (%p208_p9), [#allocation3], 4294967168  ;;  %s105_s24 = sand.u32 1, %s326_s7   ;;  %s191_s28 = sshll.u32 %s369_s10, 7  ;;  %v108_v0 = vld [vmem:[#allocation2] sm:$0xff] }
  0x24   : > { %s189_s25 = sshll.u32 %s105_s24, 3  ;;  %v109_v1 = vmul.f32 2.0, %v108_v0  ;;  %s123_s2 = scalar_lea.hbm %s449_s1, %s191_s28 }
  0x25   : > { %s107_s26 = scalar_lea.vmem [#allocation5], %s189_s25  ;;  %s112_s3 = scalar_lea.sflag [#allocation4], %s105_s24 }
  0x26   : > { %s125_s27 = sshll.u32 %s107_s26, 4  ;;  %110 = vst [vmem:[%s107_s26] sm:$0xff] %v109_v1  ;;  %s337_s5 = smov [#allocation5]   ;;  %s126_s27 = int_to_ptr.vmem [resolvable:$true] %s125_s27 }
  0x27   : > { %s270_s4 = scalar_lea.vmem %s126_s27, 128  ;;  %s274_s11 = sshll.u32 %s337_s5, 4  ;;  %s275_s11 = int_to_ptr.vmem [resolvable:$false] %s274_s11 }
  0x28   : > { %p271_p6 = scmp.ne.s32.totalorder %s126_s27, %s270_s4  ;;  %s276_s13 = scalar_lea.vmem %s275_s11, 256 }
  0x29   : > { %p277_p10 = scmp.lt.s32.totalorder %s126_s27, %s275_s11  ;;  %p278_p11 = scmp.lt.s32.totalorder %s276_s13, %s270_s4 }
  0x2a   : > { %p272_p8 = pnand %p271_p6, %p386_p5 }
  0x2b   : > { %p279_p12 = por %p278_p11, %p277_p10 }
  0x2c   : > { %p273_p9 = pneg %p272_p8 }
  0x2e   : > { %p280_p13 = pnand %p279_p12, %p273_p9 }
  0x30   : > { %283 = shalt.err (!%p280_p13)
}
  0x31   : > { %s284_s10 = scalar_lea.hbm %s123_s2, 128  ;;  %s288_s19 = scalar_lea.hbm %s449_s1, 256 }
  0x32   : > { %p285_p0 = scmp.ne.s32.totalorder %s123_s2, %s284_s10  ;;  %p289_p3 = scmp.lt.s32.totalorder %s123_s2, %s449_s1 }
  0x33   : > { %p290_p4 = scmp.lt.s32.totalorder %s288_s19, %s284_s10 }
  0x34   : > { %p286_p1 = pnand %p285_p0, %p386_p5 }
  0x35   : > { %p291_p7 = por %p290_p4, %p289_p3 }
  0x36   : > { %p287_p2 = pneg %p286_p1 }
  0x38   : > { %p292_p6 = pnand %p291_p7, %p287_p2 }
  0x3a   : > { %295 = shalt.err (!%p292_p6)
}
  0x3b   : > { %198 = dma.vmem_to_hbm [thread:$0]  (%p386_p5), %s126_s27, 128, %s123_s2, %s112_s3  }
  0x3c PF: > { %p210_p8 = scmp.ge.s32.totalorder %s334_s9, 2  ;;  %s137_s22 = sand.u32 1, %s322_s6  }
  0x3d   : > { %p453_p9 = scmp.ne.s32.totalorder %s451_s17, 0  ;;  %s138_s23 = scalar_lea.sflag [#allocation4], %s137_s22 }
  0x3f   : > { %p205_p10 = pnand %p210_p8, %p453_p9 }
  0x41   : > { %p206_p11 = pneg %p205_p10 }
  0x43   : > { %317 = dma.done.wait (%p206_p11), %s138_s23, 128  }
  0x44   : > { %319 = vsyncadd (%p206_p11), %s138_s23, 4294967168  ;;  %p12_p12 = scmp.ge.s32.totalorder %s373_s12, 4   ;;  %s454_s6 = smov %s326_s7 }
  0x45   : > { %s455_s7 = smov %s330_s8  ;;  %s456_s8 = smov %s384_s15 }
  0x46   : > { %s457_s9 = smov %s373_s12  ;;  %14 = sbr.rel (!%p12_p12) target bundleno = 4 (0x4), region = 61 }
  0x4b   :  { %143 = vsyncpa [#allocation3], 1 }
  0x4c   :  { %145 = vsyncpa [#allocation3 + $0x1], 1 }
  0x4d   :  { %146 = vsyncpa [#allocation4], 1 }
  0x4e   :  { %148 = vsyncpa [#allocation4 + $0x1], 1 }

// kernel: _forward_impl.1
= control target key start
LH: loop header
LB: loop body
LE: loop exit
PB: predicated region body
PF: predicated region fallthrough
CT: control target
= control target key end

     0   :  { %9 = vsyncpa [#allocation3], 0  ;;  %s5393_s0 = inlined_call_operand.vmem [shape: bf16[16,512], index: 0, kind: input, shape index: {}]   ;;  %s5394_s1 = inlined_call_operand.hbm [shape: bf16[512,768], index: 1, kind: input, shape index: {}]   ;;  %s5395_s2 = inlined_call_operand.hbm [shape: f32[2,768], index: 2, kind: input, shape index: {}]   ;;  %s5396_s3 = inlined_call_operand.hbm [shape: bf16[768,768], index: 3, kind: input, shape index: {}]   ;;  %s5397_s4 = inlined_call_operand.vmem [shape: bf16[16,768], index: 4, kind: output, shape index: {}]  }
   0x1   :  { %10 = vsyncpa [#allocation5], 0  ;;  %s5141_s15 = smov [#allocation4]   ;;  %s5142_s17 = smov [#allocation2]  }
   0x2   :  { %s31_s16 = sshll.u32 %s5141_s15, 4  ;;  %s18_s18 = sshll.u32 %s5142_s17, 4  ;;  %s32_s16 = int_to_ptr.vmem [resolvable:$true] %s31_s16  ;;  %s19_s18 = int_to_ptr.vmem [resolvable:$true] %s18_s18 }
   0x3   :  { %s5085_s19 = scalar_lea.vmem %s32_s16, 192  ;;  %p5090_p1 = scmp.lt.s32.totalorder %s32_s16, %s32_s16 }
   0x4   :  { %p5086_p0 = scmp.ne.s32.totalorder %s32_s16, %s5085_s19  ;;  %p5091_p2 = scmp.lt.s32.totalorder %s5085_s19, %s5085_s19 }
   0x6   :  { %p5092_p3 = por %p5091_p2, %p5090_p1 }
   0x8   :  { %p5093_p4 = pnand %p5092_p3, %p5086_p0 }
   0xa   :  { %5096 = shalt.err (!%p5093_p4)
}
   0xb   :  { %34 = dma.hbm_to_vmem [thread:$0]  %s5395_s2, 192, %s32_s16, [#allocation5]  }
   0xc   :  { %s5105_s22 = scalar_lea.vmem %s19_s18, 24576  ;;  %p5110_p6 = scmp.lt.s32.totalorder %s19_s18, %s19_s18 }
   0xd   :  { %p5106_p5 = scmp.ne.s32.totalorder %s19_s18, %s5105_s22  ;;  %p5111_p7 = scmp.lt.s32.totalorder %s5105_s22, %s5105_s22 }
   0xf   :  { %p5112_p8 = por %p5111_p7, %p5110_p6 }
  0x11   :  { %p5113_p9 = pnand %p5112_p8, %p5106_p5 }
  0x13   :  { %5116 = shalt.err (!%p5113_p9)
}
  0x14   :  { %s5143_s23 = smov 384   ;;  %s5144_s24 = smov 24  }
  0x15   :  { %24 = dma.hbm_to_vmem [thread:$0]  %s5394_s1, 24576, %s19_s18, [#allocation3], %s5143_s23, %s5143_s23, %s5144_s24  }
  0x16   :  { %s5145_s27 = smov [#allocation6]  }
  0x17   :  { %s40_s28 = sshll.u32 %s5145_s27, 4  ;;  %s41_s28 = int_to_ptr.vmem [resolvable:$true] %s40_s28 }
  0x18   :  { %s5125_s29 = scalar_lea.vmem %s41_s28, 36864  ;;  %p5130_p11 = scmp.lt.s32.totalorder %s41_s28, %s41_s28 }
  0x19   :  { %p5126_p10 = scmp.ne.s32.totalorder %s41_s28, %s5125_s29  ;;  %p5131_p12 = scmp.lt.s32.totalorder %s5125_s29, %s5125_s29 }
  0x1b   :  { %p5132_p13 = por %p5131_p12, %p5130_p11 }
  0x1d   :  { %p5133_p0 = pnand %p5132_p13, %p5126_p10 }
  0x1f   :  { %5136 = shalt.err (!%p5133_p0)
}
  0x20   :  { %46 = dma.hbm_to_vmem [thread:$0]  %s5396_s3, 36864, %s41_s28, [#allocation5], %s5143_s23, %s5143_s23, %s5144_s24  }
  0x21   :  { %5137 = dma.done.wait [#allocation3], 24576  }
  0x22   :  { %5138 = vsyncadd [#allocation3], 4294942720 }
  0x23   :  { %5139 = dma.done.wait [#allocation5], 37056  }
  0x24   :  { %5140 = vsyncadd [#allocation5], 4294930240  ;;  %v4351_v0 = vld [vmem:[#allocation2 + $0x154] ss:$24 sps:$4 sm:$0xff]   ;;  %v4355_v2 = vld [vmem:[#allocation2 + $0x150] ss:$24 sps:$4 sm:$0xff]  }
  0x25   :  { %v4353_v1 = vld [vmem:[#allocation2 + $0x454] ss:$24 sps:$4 sm:$0xff]   ;;  %1295 = vmatprep.subr.bf16.mxu0 %v4351_v0  ;;  %v4356_v3 = vld [vmem:[#allocation2 + $0x450] ss:$24 sps:$4 sm:$0xff]   ;;  %v4357_v4 = vld [vmem:[#allocation2 + $0x124] ss:$24 sps:$4 sm:$0xff]  }
  0x26   :  { %1338 = vmatprep.subr.bf16.mxu1 %v4353_v1  ;;  %1296 = vmatpush1.bf16.msra.mxu0 %v4355_v2  ;;  %v4359_v5 = vld [vmem:[#allocation2 + $0x424] ss:$24 sps:$4 sm:$0xff]   ;;  %v4361_v6 = vld [vmem:[#allocation2 + $0x120] ss:$24 sps:$4 sm:$0xff]   ;;  %v4363_v8 = vld [vmem:[#allocation2 + $0xf4] ss:$24 sps:$4 sm:$0xff]  }
  0x27   :  { %1339 = vmatpush1.bf16.msra.mxu1 %v4356_v3  ;;  %1297 = vmatprep.subr.bf16.mxu0 %v4357_v4  ;;  %v4362_v7 = vld [vmem:[#allocation2 + $0x420] ss:$24 sps:$4 sm:$0xff]   ;;  %v4365_v9 = vld [vmem:[#allocation2 + $0x3f4] ss:$24 sps:$4 sm:$0xff]   ;;  %v4367_v10 = vld [vmem:[#allocation2 + $0xf0] ss:$24 sps:$4 sm:$0xff]  }
  0x28   :  { %1340 = vmatprep.subr.bf16.mxu1 %v4359_v5  ;;  %v4368_v11 = vld [vmem:[#allocation2 + $0x3f0] ss:$24 sps:$4 sm:$0xff]   ;;  %v4369_v12 = vld [vmem:[#allocation2 + $0xc4] ss:$24 sps:$4 sm:$0xff]   ;;  %v4373_v14 = vld [vmem:[#allocation2 + $0xc0] ss:$24 sps:$4 sm:$0xff]  }
  0x29   :  { %v4371_v13 = vld [vmem:[#allocation2 + $0x3c4] ss:$24 sps:$4 sm:$0xff]   ;;  %v4374_v15 = vld [vmem:[#allocation2 + $0x3c0] ss:$24 sps:$4 sm:$0xff]   ;;  %v4375_v16 = vld [vmem:[#allocation2 + $0x94] ss:$24 sps:$4 sm:$0xff]  }
  0x2a   :  { %1298 = vmatpush1.bf16.msra.mxu0 %v4361_v6  ;;  %v4377_v17 = vld [vmem:[#allocation2 + $0x394] ss:$24 sps:$4 sm:$0xff]   ;;  %v4379_v18 = vld [vmem:[#allocation2 + $0x90] ss:$24 sps:$4 sm:$0xff]   ;;  %v4381_v20 = vld [vmem:[#allocation2 + $0x64] ss:$24 sps:$4 sm:$0xff]  }
  0x2b   :  { %1341 = vmatpush1.bf16.msra.mxu1 %v4362_v7  ;;  %1299 = vmatprep.subr.bf16.mxu0 %v4363_v8  ;;  %v4380_v19 = vld [vmem:[#allocation2 + $0x390] ss:$24 sps:$4 sm:$0xff]   ;;  %v4383_v21 = vld [vmem:[#allocation2 + $0x364] ss:$24 sps:$4 sm:$0xff]   ;;  %v4385_v22 = vld [vmem:[#allocation2 + $0x60] ss:$24 sps:$4 sm:$0xff]  }
  0x2c   :  { %1342 = vmatprep.subr.bf16.mxu1 %v4365_v9  ;;  %v4386_v23 = vld [vmem:[#allocation2 + $0x360] ss:$24 sps:$4 sm:$0xff]   ;;  %v4387_v24 = vld [vmem:[#allocation2 + $0x34] ss:$24 sps:$4 sm:$0xff]   ;;  %v4391_v26 = vld [vmem:[#allocation2 + $0x30] ss:$24 sps:$4 sm:$0xff]  }
  0x2d   :  { %v4389_v25 = vld [vmem:[#allocation2 + $0x334] ss:$24 sps:$4 sm:$0xff]   ;;  %v4392_v27 = vld [vmem:[#allocation2 + $0x330] ss:$24 sps:$4 sm:$0xff]   ;;  %v4393_v28 = vld [vmem:[#allocation2 + $0x4] ss:$24 sps:$4 sm:$0xff]  }
  0x2e   :  { %1300 = vmatpush1.bf16.msra.mxu0 %v4367_v10  ;;  %v4395_v29 = vld [vmem:[#allocation2 + $0x304] ss:$24 sps:$4 sm:$0xff]   ;;  %v4397_v30 = vld [vmem:[#allocation2] ss:$24 sps:$4 sm:$0xff]   ;;  %v4399_v32 = vld [vmem:[#allocation2 + $0x2d4] ss:$24 sps:$4 sm:$0xff]  }
  0x2f   :  { %1343 = vmatpush1.bf16.msra.mxu1 %v4368_v11  ;;  %1301 = vmatprep.subr.bf16.mxu0 %v4369_v12  ;;  %v4398_v31 = vld [vmem:[#allocation2 + $0x300] ss:$24 sps:$4 sm:$0xff]   ;;  %v4401_v33 = vld [vmem:[#allocation2 + $0x5d4] ss:$24 sps:$4 sm:$0xff]   ;;  %v4403_v34 = vld [vmem:[#allocation2 + $0x2d0] ss:$24 sps:$4 sm:$0xff]  }
  0x30   :  { %1344 = vmatprep.subr.bf16.mxu1 %v4371_v13  ;;  %v4404_v35 = vld [vmem:[#allocation2 + $0x5d0] ss:$24 sps:$4 sm:$0xff]   ;;  %v4405_v36 = vld [vmem:[#allocation2 + $0x2a4] ss:$24 sps:$4 sm:$0xff]   ;;  %v4409_v38 = vld [vmem:[#allocation2 + $0x2a0] ss:$24 sps:$4 sm:$0xff]  }
  0x31   :  { %v4407_v37 = vld [vmem:[#allocation2 + $0x5a4] ss:$24 sps:$4 sm:$0xff]   ;;  %v4410_v39 = vld [vmem:[#allocation2 + $0x5a0] ss:$24 sps:$4 sm:$0xff]   ;;  %v4411_v40 = vld [vmem:[#allocation2 + $0x274] ss:$24 sps:$4 sm:$0xff]  }
  0x32   :  { %1302 = vmatpush1.bf16.msra.mxu0 %v4373_v14  ;;  %v4413_v41 = vld [vmem:[#allocation2 + $0x574] ss:$24 sps:$4 sm:$0xff]   ;;  %v4415_v42 = vld [vmem:[#allocation2 + $0x270] ss:$24 sps:$4 sm:$0xff]   ;;  %v4417_v44 = vld [vmem:[#allocation2 + $0x244] ss:$24 sps:$4 sm:$0xff]  }
  0x33   :  { %1345 = vmatpush1.bf16.msra.mxu1 %v4374_v15  ;;  %1303 = vmatprep.subr.bf16.mxu0 %v4375_v16  ;;  %v4416_v43 = vld [vmem:[#allocation2 + $0x570] ss:$24 sps:$4 sm:$0xff]   ;;  %v4419_v45 = vld [vmem:[#allocation2 + $0x544] ss:$24 sps:$4 sm:$0xff]   ;;  %v4421_v46 = vld [vmem:[#allocation2 + $0x240] ss:$24 sps:$4 sm:$0xff]  }
  0x34   :  { %1346 = vmatprep.subr.bf16.mxu1 %v4377_v17  ;;  %v4422_v47 = vld [vmem:[#allocation2 + $0x540] ss:$24 sps:$4 sm:$0xff]   ;;  %v61_v49 = vld [vmem:[%s5393_s0 + $0x10] sm:$0xff]  ;;  %v5146_v50 = vmov 0   ;;  %v60_v52 = vld [vmem:[%s5393_s0 + $0x8] sm:$0xff] }
  0x35   :  { %v59_v48 = vld [vmem:[%s5393_s0] sm:$0xff]  ;;  %v62_v53 = vld [vmem:[%s5393_s0 + $0x18] sm:$0xff]  ;;  %v4423_v54 = vld [vmem:[#allocation2 + $0x214] ss:$24 sps:$4 sm:$0xff]   ;;  %v65_v55 = vmax.bf16 %v5146_v50, %v61_v49  ;;  %v64_v56 = vmax.bf16 %v5146_v50, %v60_v52 }
  0x36   :  { %1304 = vmatpush1.bf16.msra.mxu0 %v4379_v18  ;;  %v63_v51 = vmax.bf16 %v5146_v50, %v59_v48  ;;  %v66_v57 = vmax.bf16 %v5146_v50, %v62_v53  ;;  %v4425_v58 = vld [vmem:[#allocation2 + $0x514] ss:$24 sps:$4 sm:$0xff]   ;;  %v4427_v61 = vld [vmem:[#allocation2 + $0x210] ss:$24 sps:$4 sm:$0xff]   ;;  %v4429_v63 = vld [vmem:[#allocation2 + $0x1e4] ss:$24 sps:$4 sm:$0xff]  }
  0x37   :  { %1347 = vmatpush1.bf16.msra.mxu1 %v4380_v19  ;;  %1305 = vmatprep.subr.bf16.mxu0 %v4381_v20  ;;  %v4428_v62 = vld [vmem:[#allocation2 + $0x510] ss:$24 sps:$4 sm:$0xff]   ;;  %v4431_v0 = vld [vmem:[#allocation2 + $0x4e4] ss:$24 sps:$4 sm:$0xff]   ;;  %v4433_v1 = vld [vmem:[#allocation2 + $0x1e0] ss:$24 sps:$4 sm:$0xff]  }
  0x38   :  { %1348 = vmatprep.subr.bf16.mxu1 %v4383_v21  ;;  %v5193_v59 = vcombine.high %v63_v51, %v65_v55  ;;  %v5195_v60 = vcombine.high %v64_v56, %v66_v57  ;;  %v4434_v2 = vld [vmem:[#allocation2 + $0x4e0] ss:$24 sps:$4 sm:$0xff]   ;;  %v4435_v3 = vld [vmem:[#allocation2 + $0x1b4] ss:$24 sps:$4 sm:$0xff]   ;;  %v4439_v5 = vld [vmem:[#allocation2 + $0x1b0] ss:$24 sps:$4 sm:$0xff]   ;;  %v5199_v13 = vcombine.low %v63_v51, %v65_v55  ;;  %v5201_v14 = vcombine.low %v64_v56, %v66_v57 }
  0x39   :  { %v4437_v4 = vld [vmem:[#allocation2 + $0x4b4] ss:$24 sps:$4 sm:$0xff]   ;;  %v4440_v6 = vld [vmem:[#allocation2 + $0x4b0] ss:$24 sps:$4 sm:$0xff]   ;;  %v4441_v7 = vld [vmem:[#allocation2 + $0x184] ss:$24 sps:$4 sm:$0xff]  }
  0x3a   :  { %1306 = vmatpush1.bf16.msra.mxu0 %v4385_v22  ;;  %1327 = vmatprep.mubr.bf16.mxu0 %v5193_v59  ;;  %v4443_v8 = vld [vmem:[#allocation2 + $0x484] ss:$24 sps:$4 sm:$0xff]   ;;  %v4445_v9 = vld [vmem:[#allocation2 + $0x180] ss:$24 sps:$4 sm:$0xff]  }
  0x3b   :  { %1349 = vmatpush1.bf16.msra.mxu1 %v4386_v23  ;;  %1307 = vmatprep.subr.bf16.mxu0 %v4387_v24  ;;  %v4446_v10 = vld [vmem:[#allocation2 + $0x480] ss:$24 sps:$4 sm:$0xff]   ;;  %v4449_v11 = vld [vmem:[#allocation2 + $0x15c] ss:$24 sps:$4 sm:$0xff]   ;;  %v4455_v17 = vld [vmem:[#allocation2 + $0x12c] ss:$24 sps:$4 sm:$0xff]  }
  0x3c   :  { %1350 = vmatprep.subr.bf16.mxu1 %v4389_v25  ;;  %1370 = vmatprep.mubr.bf16.mxu1 %v5195_v60  ;;  %v4452_v12 = vld [vmem:[#allocation2 + $0x45c] ss:$24 sps:$4 sm:$0xff]   ;;  %v4447_v15 = vld [vmem:[#allocation2 + $0x158] ss:$24 sps:$4 sm:$0xff]   ;;  %v4458_v18 = vld [vmem:[#allocation2 + $0x42c] ss:$24 sps:$4 sm:$0xff]  }
  0x3d   :  { %v4450_v16 = vld [vmem:[#allocation2 + $0x458] ss:$24 sps:$4 sm:$0xff]   ;;  %v4453_v19 = vld [vmem:[#allocation2 + $0x128] ss:$24 sps:$4 sm:$0xff]   ;;  %v4461_v21 = vld [vmem:[#allocation2 + $0xfc] ss:$24 sps:$4 sm:$0xff]  }
  0x3e   :  { %1308 = vmatpush1.bf16.msra.mxu0 %v4391_v26  ;;  %v4456_v20 = vld [vmem:[#allocation2 + $0x428] ss:$24 sps:$4 sm:$0xff]   ;;  %v4464_v22 = vld [vmem:[#allocation2 + $0x3fc] ss:$24 sps:$4 sm:$0xff]   ;;  %v4459_v23 = vld [vmem:[#allocation2 + $0xf8] ss:$24 sps:$4 sm:$0xff]  }
  0x3f   :  { %1351 = vmatpush1.bf16.msra.mxu1 %v4392_v27  ;;  %1309 = vmatprep.subr.bf16.mxu0 %v4393_v28  ;;  %v4462_v24 = vld [vmem:[#allocation2 + $0x3f8] ss:$24 sps:$4 sm:$0xff]   ;;  %v4467_v25 = vld [vmem:[#allocation2 + $0xcc] ss:$24 sps:$4 sm:$0xff]   ;;  %v4465_v27 = vld [vmem:[#allocation2 + $0xc8] ss:$24 sps:$4 sm:$0xff]  }
  0x40   :  { %1352 = vmatprep.subr.bf16.mxu1 %v4395_v29  ;;  %v4470_v26 = vld [vmem:[#allocation2 + $0x3cc] ss:$24 sps:$4 sm:$0xff]   ;;  %v4468_v28 = vld [vmem:[#allocation2 + $0x3c8] ss:$24 sps:$4 sm:$0xff]   ;;  %v4473_v29 = vld [vmem:[#allocation2 + $0x9c] ss:$24 sps:$4 sm:$0xff]  }
  0x41   :  { %v4498_v48 = vld [vmem:[#allocation2 + $0x5d8] ss:$24 sps:$4 sm:$0xff]   ;;  %v4503_v49 = vld [vmem:[#allocation2 + $0x2ac] ss:$24 sps:$4 sm:$0xff]   ;;  %v4501_v51 = vld [vmem:[#allocation2 + $0x2a8] ss:$24 sps:$4 sm:$0xff]  }
  0x42   :  { %1310 = vmatpush1.bf16.msra.mxu0 %v4397_v30  ;;  %v4476_v30 = vld [vmem:[#allocation2 + $0x39c] ss:$24 sps:$4 sm:$0xff]   ;;  %v4506_v50 = vld [vmem:[#allocation2 + $0x5ac] ss:$24 sps:$4 sm:$0xff]   ;;  %v4504_v52 = vld [vmem:[#allocation2 + $0x5a8] ss:$24 sps:$4 sm:$0xff]  }
  0x43   :  { %1353 = vmatpush1.bf16.msra.mxu1 %v4398_v31  ;;  %1311 = vmatprep.subr.bf16.mxu0 %v4399_v32  ;;  %v4471_v31 = vld [vmem:[#allocation2 + $0x98] ss:$24 sps:$4 sm:$0xff]   ;;  %v4509_v53 = vld [vmem:[#allocation2 + $0x27c] ss:$24 sps:$4 sm:$0xff]   ;;  %v4515_v57 = vld [vmem:[#allocation2 + $0x24c] ss:$24 sps:$4 sm:$0xff]  }
  0x44   :  { %1354 = vmatprep.subr.bf16.mxu1 %v4401_v33  ;;  %v4474_v32 = vld [vmem:[#allocation2 + $0x398] ss:$24 sps:$4 sm:$0xff]   ;;  %v4479_v33 = vld [vmem:[#allocation2 + $0x6c] ss:$24 sps:$4 sm:$0xff]  }
  0x45   :  { %v4507_v55 = vld [vmem:[#allocation2 + $0x278] ss:$24 sps:$4 sm:$0xff]  }
  0x46   :  { %1312 = vmatpush2.bf16.msra.mxu0 %v4403_v34  ;;  %v4482_v34 = vld [vmem:[#allocation2 + $0x36c] ss:$24 sps:$4 sm:$0xff]   ;;  %v4510_v56 = vld [vmem:[#allocation2 + $0x578] ss:$24 sps:$4 sm:$0xff]  }
  0x47   :  { %1355 = vmatpush2.bf16.msra.mxu1 %v4404_v35  ;;  %1313 = vmatprep.subr.bf16.mxu0 %v4405_v36  ;;  %v4477_v35 = vld [vmem:[#allocation2 + $0x68] ss:$24 sps:$4 sm:$0xff]  }
  0x48   :  { %1356 = vmatprep.subr.bf16.mxu1 %v4407_v37  ;;  %v4480_v36 = vld [vmem:[#allocation2 + $0x368] ss:$24 sps:$4 sm:$0xff]   ;;  %v4485_v37 = vld [vmem:[#allocation2 + $0x3c] ss:$24 sps:$4 sm:$0xff]  }
  0x4a   :  { %1314 = vmatpush2.bf16.msra.mxu0 %v4409_v38  ;;  %v4488_v38 = vld [vmem:[#allocation2 + $0x33c] ss:$24 sps:$4 sm:$0xff]  }
  0x4b   :  { %1357 = vmatpush2.bf16.msra.mxu1 %v4410_v39  ;;  %1315 = vmatprep.subr.bf16.mxu0 %v4411_v40  ;;  %v4483_v39 = vld [vmem:[#allocation2 + $0x38] ss:$24 sps:$4 sm:$0xff]  }
  0x4c   :  { %1358 = vmatprep.subr.bf16.mxu1 %v4413_v41  ;;  %v4486_v40 = vld [vmem:[#allocation2 + $0x338] ss:$24 sps:$4 sm:$0xff]   ;;  %v4491_v41 = vld [vmem:[#allocation2 + $0xc] ss:$24 sps:$4 sm:$0xff]  }
  0x4e   :  { %1316 = vmatpush2.bf16.msra.mxu0 %v4415_v42  ;;  %v4494_v42 = vld [vmem:[#allocation2 + $0x30c] ss:$24 sps:$4 sm:$0xff]  }
  0x4f   :  { %1359 = vmatpush2.bf16.msra.mxu1 %v4416_v43  ;;  %1317 = vmatprep.subr.bf16.mxu0 %v4417_v44  ;;  %v4489_v43 = vld [vmem:[#allocation2 + $0x8] ss:$24 sps:$4 sm:$0xff]  }
  0x50   :  { %1360 = vmatprep.subr.bf16.mxu1 %v4419_v45  ;;  %v4492_v44 = vld [vmem:[#allocation2 + $0x308] ss:$24 sps:$4 sm:$0xff]   ;;  %v4497_v45 = vld [vmem:[#allocation2 + $0x2dc] ss:$24 sps:$4 sm:$0xff]  }
  0x52   :  { %1318 = vmatpush2.bf16.msra.mxu0 %v4421_v46  ;;  %v4500_v46 = vld [vmem:[#allocation2 + $0x5dc] ss:$24 sps:$4 sm:$0xff]  }
  0x53   :  { %1361 = vmatpush2.bf16.msra.mxu1 %v4422_v47  ;;  %1319 = vmatprep.subr.bf16.mxu0 %v4423_v54  ;;  %v4495_v47 = vld [vmem:[#allocation2 + $0x2d8] ss:$24 sps:$4 sm:$0xff]   ;;  %v4512_v54 = vld [vmem:[#allocation2 + $0x57c] ss:$24 sps:$4 sm:$0xff]  }
  0x54   :  { %1362 = vmatprep.subr.bf16.mxu1 %v4425_v58  ;;  %v4518_v58 = vld [vmem:[#allocation2 + $0x54c] ss:$24 sps:$4 sm:$0xff]  }
  0x56   :  { %1320 = vmatpush2.bf16.msra.mxu0 %v4427_v61  ;;  %v4513_v61 = vld [vmem:[#allocation2 + $0x248] ss:$24 sps:$4 sm:$0xff]  }
  0x57   :  { %1363 = vmatpush2.bf16.msra.mxu1 %v4428_v62  ;;  %1321 = vmatprep.subr.bf16.mxu0 %v4429_v63  ;;  %v4516_v62 = vld [vmem:[#allocation2 + $0x548] ss:$24 sps:$4 sm:$0xff]   ;;  %v4521_v63 = vld [vmem:[#allocation2 + $0x21c] ss:$24 sps:$4 sm:$0xff]  }
  0x58   :  { %1364 = vmatprep.subr.bf16.mxu1 %v4431_v0  ;;  %v4524_v0 = vld [vmem:[#allocation2 + $0x51c] ss:$24 sps:$4 sm:$0xff]  }
  0x5a   :  { %1322 = vmatpush2.bf16.msra.mxu0 %v4433_v1  ;;  %v4519_v1 = vld [vmem:[#allocation2 + $0x218] ss:$24 sps:$4 sm:$0xff]  }
  0x5b   :  { %1365 = vmatpush2.bf16.msra.mxu1 %v4434_v2  ;;  %1323 = vmatprep.subr.bf16.mxu0 %v4435_v3  ;;  %v4522_v2 = vld [vmem:[#allocation2 + $0x518] ss:$24 sps:$4 sm:$0xff]   ;;  %v4527_v3 = vld [vmem:[#allocation2 + $0x1ec] ss:$24 sps:$4 sm:$0xff]  }
  0x5c   :  { %1366 = vmatprep.subr.bf16.mxu1 %v4437_v4  ;;  %v4530_v4 = vld [vmem:[#allocation2 + $0x4ec] ss:$24 sps:$4 sm:$0xff]  }
  0x5e   :  { %1324 = vmatpush2.bf16.msra.mxu0 %v4439_v5  ;;  %v4525_v5 = vld [vmem:[#allocation2 + $0x1e8] ss:$24 sps:$4 sm:$0xff]  }
  0x5f   :  { %1367 = vmatpush2.bf16.msra.mxu1 %v4440_v6  ;;  %1325 = vmatprep.subr.bf16.mxu0 %v4441_v7  ;;  %v4528_v6 = vld [vmem:[#allocation2 + $0x4e8] ss:$24 sps:$4 sm:$0xff]   ;;  %v4533_v7 = vld [vmem:[#allocation2 + $0x1bc] ss:$24 sps:$4 sm:$0xff]  }
  0x60   :  { %1368 = vmatprep.subr.bf16.mxu1 %v4443_v8  ;;  %v4536_v8 = vld [vmem:[#allocation2 + $0x4bc] ss:$24 sps:$4 sm:$0xff]  }
  0x62   :  { %1326 = vmatpush2.bf16.msra.mxu0 %v4445_v9  ;;  %v4531_v9 = vld [vmem:[#allocation2 + $0x1b8] ss:$24 sps:$4 sm:$0xff]  }
  0x63   :  { %1369 = vmatpush2.bf16.msra.mxu1 %v4446_v10  ;;  %1381 = vmatprep.subr.bf16.mxu0 %v4449_v11  ;;  %v4534_v10 = vld [vmem:[#allocation2 + $0x4b8] ss:$24 sps:$4 sm:$0xff]   ;;  %v4539_v11 = vld [vmem:[#allocation2 + $0x18c] ss:$24 sps:$4 sm:$0xff]  }
  0x64   :  { %1424 = vmatprep.subr.bf16.mxu1 %v4452_v12  ;;  %v4542_v12 = vld [vmem:[#allocation2 + $0x48c] ss:$24 sps:$4 sm:$0xff]  }
  0x65   :  { %1328 = vmatmul.mubr.bf16.vlgmr.msra.gmra.mxu0 %v5199_v13 }
  0x66   :  { %1371 = vmatmul.mubr.bf16.vlgmr.msra.gmra.mxu1 %v5201_v14  ;;  %1382 = vmatpush1.bf16.msra.mxu0 %v4447_v15  ;;  %v4537_v15 = vld [vmem:[#allocation2 + $0x188] ss:$24 sps:$4 sm:$0xff]  }
  0x67   :  { %1425 = vmatpush1.bf16.msra.mxu1 %v4450_v16  ;;  %1383 = vmatprep.subr.bf16.mxu0 %v4455_v17  ;;  %v4540_v16 = vld [vmem:[#allocation2 + $0x488] ss:$24 sps:$4 sm:$0xff]   ;;  %v4545_v17 = vld [vmem:[#allocation2 + $0x164] ss:$24 sps:$4 sm:$0xff]  }
  0x68   :  { %1426 = vmatprep.subr.bf16.mxu1 %v4458_v18  ;;  %1413 = vmatprep.mubr.bf16.mxu0 %v5193_v59  ;;  %v4548_v18 = vld [vmem:[#allocation2 + $0x464] ss:$24 sps:$4 sm:$0xff]  }
  0x69   :  { %1456 = vmatprep.mubr.bf16.mxu1 %v5195_v60 }
  0x6a   :  { %1384 = vmatpush1.bf16.msra.mxu0 %v4453_v19  ;;  %v4543_v19 = vld [vmem:[#allocation2 + $0x160] ss:$24 sps:$4 sm:$0xff]  }
  0x6b   :  { %1427 = vmatpush1.bf16.msra.mxu1 %v4456_v20  ;;  %1385 = vmatprep.subr.bf16.mxu0 %v4461_v21  ;;  %v4546_v20 = vld [vmem:[#allocation2 + $0x460] ss:$24 sps:$4 sm:$0xff]   ;;  %v4551_v21 = vld [vmem:[#allocation2 + $0x134] ss:$24 sps:$4 sm:$0xff]  }
  0x6c   :  { %1428 = vmatprep.subr.bf16.mxu1 %v4464_v22  ;;  %v4554_v22 = vld [vmem:[#allocation2 + $0x434] ss:$24 sps:$4 sm:$0xff]  }
  0x6e   :  { %1386 = vmatpush1.bf16.msra.mxu0 %v4459_v23  ;;  %v4549_v23 = vld [vmem:[#allocation2 + $0x130] ss:$24 sps:$4 sm:$0xff]  }
  0x6f   :  { %1429 = vmatpush1.bf16.msra.mxu1 %v4462_v24  ;;  %1387 = vmatprep.subr.bf16.mxu0 %v4467_v25  ;;  %v4552_v24 = vld [vmem:[#allocation2 + $0x430] ss:$24 sps:$4 sm:$0xff]   ;;  %v4557_v25 = vld [vmem:[#allocation2 + $0x104] ss:$24 sps:$4 sm:$0xff]  }
  0x70   :  { %1430 = vmatprep.subr.bf16.mxu1 %v4470_v26  ;;  %v4560_v26 = vld [vmem:[#allocation2 + $0x404] ss:$24 sps:$4 sm:$0xff]  }
  0x72   :  { %1388 = vmatpush1.bf16.msra.mxu0 %v4465_v27  ;;  %v4555_v27 = vld [vmem:[#allocation2 + $0x100] ss:$24 sps:$4 sm:$0xff]  }
  0x73   :  { %1431 = vmatpush1.bf16.msra.mxu1 %v4468_v28  ;;  %1389 = vmatprep.subr.bf16.mxu0 %v4473_v29  ;;  %v4558_v28 = vld [vmem:[#allocation2 + $0x400] ss:$24 sps:$4 sm:$0xff]   ;;  %v4563_v29 = vld [vmem:[#allocation2 + $0xd4] ss:$24 sps:$4 sm:$0xff]  }
  0x74   :  { %1432 = vmatprep.subr.bf16.mxu1 %v4476_v30  ;;  %v4566_v30 = vld [vmem:[#allocation2 + $0x3d4] ss:$24 sps:$4 sm:$0xff]  }
  0x76   :  { %1390 = vmatpush1.bf16.msra.mxu0 %v4471_v31  ;;  %v4561_v31 = vld [vmem:[#allocation2 + $0xd0] ss:$24 sps:$4 sm:$0xff]  }
  0x77   :  { %1433 = vmatpush1.bf16.msra.mxu1 %v4474_v32  ;;  %1391 = vmatprep.subr.bf16.mxu0 %v4479_v33  ;;  %v4564_v32 = vld [vmem:[#allocation2 + $0x3d0] ss:$24 sps:$4 sm:$0xff]   ;;  %v4569_v33 = vld [vmem:[#allocation2 + $0xa4] ss:$24 sps:$4 sm:$0xff]  }
  0x78   :  { %1434 = vmatprep.subr.bf16.mxu1 %v4482_v34  ;;  %v4572_v34 = vld [vmem:[#allocation2 + $0x3a4] ss:$24 sps:$4 sm:$0xff]  }
  0x7a   :  { %1392 = vmatpush1.bf16.msra.mxu0 %v4477_v35  ;;  %v4567_v35 = vld [vmem:[#allocation2 + $0xa0] ss:$24 sps:$4 sm:$0xff]  }
  0x7b   :  { %1435 = vmatpush1.bf16.msra.mxu1 %v4480_v36  ;;  %1393 = vmatprep.subr.bf16.mxu0 %v4485_v37  ;;  %v4570_v36 = vld [vmem:[#allocation2 + $0x3a0] ss:$24 sps:$4 sm:$0xff]   ;;  %v4575_v37 = vld [vmem:[#allocation2 + $0x74] ss:$24 sps:$4 sm:$0xff]  }
  0x7c   :  { %1436 = vmatprep.subr.bf16.mxu1 %v4488_v38  ;;  %v4576_v38 = vld [vmem:[#allocation2 + $0x370] ss:$24 sps:$4 sm:$0xff]  }
  0x7e   :  { %1394 = vmatpush1.bf16.msra.mxu0 %v4483_v39  ;;  %v4581_v39 = vld [vmem:[#allocation2 + $0x44] ss:$24 sps:$4 sm:$0xff]  }
  0x7f   :  { %1437 = vmatpush1.bf16.msra.mxu1 %v4486_v40  ;;  %1395 = vmatprep.subr.bf16.mxu0 %v4491_v41  ;;  %v4584_v40 = vld [vmem:[#allocation2 + $0x344] ss:$24 sps:$4 sm:$0xff]   ;;  %v4579_v41 = vld [vmem:[#allocation2 + $0x40] ss:$24 sps:$4 sm:$0xff]  }
  0x80   :  { %1438 = vmatprep.subr.bf16.mxu1 %v4494_v42  ;;  %v4582_v42 = vld [vmem:[#allocation2 + $0x340] ss:$24 sps:$4 sm:$0xff]  }
  0x82   :  { %1396 = vmatpush1.bf16.msra.mxu0 %v4489_v43  ;;  %v4587_v43 = vld [vmem:[#allocation2 + $0x14] ss:$24 sps:$4 sm:$0xff]  }
  0x83   :  { %1439 = vmatpush1.bf16.msra.mxu1 %v4492_v44  ;;  %1397 = vmatprep.subr.bf16.mxu0 %v4497_v45  ;;  %v4590_v44 = vld [vmem:[#allocation2 + $0x314] ss:$24 sps:$4 sm:$0xff]   ;;  %v4585_v45 = vld [vmem:[#allocation2 + $0x10] ss:$24 sps:$4 sm:$0xff]  }
  0x84   :  { %1440 = vmatprep.subr.bf16.mxu1 %v4500_v46  ;;  %v4588_v46 = vld [vmem:[#allocation2 + $0x310] ss:$24 sps:$4 sm:$0xff]  }
  0x86   :  { %1398 = vmatpush2.bf16.msra.mxu0 %v4495_v47  ;;  %v4593_v47 = vld [vmem:[#allocation2 + $0x2e4] ss:$24 sps:$4 sm:$0xff]  }
  0x87   :  { %1441 = vmatpush2.bf16.msra.mxu1 %v4498_v48  ;;  %1399 = vmatprep.subr.bf16.mxu0 %v4503_v49  ;;  %v4596_v48 = vld [vmem:[#allocation2 + $0x5e4] ss:$24 sps:$4 sm:$0xff]   ;;  %v4591_v49 = vld [vmem:[#allocation2 + $0x2e0] ss:$24 sps:$4 sm:$0xff]  }
  0x88   :  { %1442 = vmatprep.subr.bf16.mxu1 %v4506_v50  ;;  %v4594_v50 = vld [vmem:[#allocation2 + $0x5e0] ss:$24 sps:$4 sm:$0xff]  }
  0x8a   :  { %1400 = vmatpush2.bf16.msra.mxu0 %v4501_v51  ;;  %v4599_v51 = vld [vmem:[#allocation2 + $0x2b4] ss:$24 sps:$4 sm:$0xff]  }
  0x8b   :  { %1443 = vmatpush2.bf16.msra.mxu1 %v4504_v52  ;;  %1401 = vmatprep.subr.bf16.mxu0 %v4509_v53  ;;  %v4602_v52 = vld [vmem:[#allocation2 + $0x5b4] ss:$24 sps:$4 sm:$0xff]   ;;  %v4597_v53 = vld [vmem:[#allocation2 + $0x2b0] ss:$24 sps:$4 sm:$0xff]  }
  0x8c   :  { %1444 = vmatprep.subr.bf16.mxu1 %v4512_v54  ;;  %v4600_v54 = vld [vmem:[#allocation2 + $0x5b0] ss:$24 sps:$4 sm:$0xff]  }
  0x8e   :  { %1402 = vmatpush2.bf16.msra.mxu0 %v4507_v55  ;;  %v4605_v55 = vld [vmem:[#allocation2 + $0x284] ss:$24 sps:$4 sm:$0xff]  }
  0x8f   :  { %1445 = vmatpush2.bf16.msra.mxu1 %v4510_v56  ;;  %1403 = vmatprep.subr.bf16.mxu0 %v4515_v57  ;;  %v4608_v56 = vld [vmem:[#allocation2 + $0x584] ss:$24 sps:$4 sm:$0xff]   ;;  %v4603_v57 = vld [vmem:[#allocation2 + $0x280] ss:$24 sps:$4 sm:$0xff]  }
  0x90   :  { %1446 = vmatprep.subr.bf16.mxu1 %v4518_v58  ;;  %v4606_v58 = vld [vmem:[#allocation2 + $0x580] ss:$24 sps:$4 sm:$0xff]  }
  0x92   :  { %1404 = vmatpush2.bf16.msra.mxu0 %v4513_v61  ;;  %v4611_v61 = vld [vmem:[#allocation2 + $0x254] ss:$24 sps:$4 sm:$0xff]  }
  0x93   :  { %1447 = vmatpush2.bf16.msra.mxu1 %v4516_v62  ;;  %1405 = vmatprep.subr.bf16.mxu0 %v4521_v63  ;;  %v4614_v62 = vld [vmem:[#allocation2 + $0x554] ss:$24 sps:$4 sm:$0xff]   ;;  %v4609_v63 = vld [vmem:[#allocation2 + $0x250] ss:$24 sps:$4 sm:$0xff]  }
  0x94   :  { %1448 = vmatprep.subr.bf16.mxu1 %v4524_v0  ;;  %v4612_v0 = vld [vmem:[#allocation2 + $0x550] ss:$24 sps:$4 sm:$0xff]  }
  0x96   :  { %1406 = vmatpush2.bf16.msra.mxu0 %v4519_v1  ;;  %v4617_v1 = vld [vmem:[#allocation2 + $0x224] ss:$24 sps:$4 sm:$0xff]  }
  0x97   :  { %1449 = vmatpush2.bf16.msra.mxu1 %v4522_v2  ;;  %1407 = vmatprep.subr.bf16.mxu0 %v4527_v3  ;;  %v4620_v2 = vld [vmem:[#allocation2 + $0x524] ss:$24 sps:$4 sm:$0xff]   ;;  %v4615_v3 = vld [vmem:[#allocation2 + $0x220] ss:$24 sps:$4 sm:$0xff]  }
  0x98   :  { %1450 = vmatprep.subr.bf16.mxu1 %v4530_v4  ;;  %v4618_v4 = vld [vmem:[#allocation2 + $0x520] ss:$24 sps:$4 sm:$0xff]  }
  0x9a   :  { %1408 = vmatpush2.bf16.msra.mxu0 %v4525_v5  ;;  %v4623_v5 = vld [vmem:[#allocation2 + $0x1f4] ss:$24 sps:$4 sm:$0xff]  }
  0x9b   :  { %1451 = vmatpush2.bf16.msra.mxu1 %v4528_v6  ;;  %1409 = vmatprep.subr.bf16.mxu0 %v4533_v7  ;;  %v4626_v6 = vld [vmem:[#allocation2 + $0x4f4] ss:$24 sps:$4 sm:$0xff]   ;;  %v4621_v7 = vld [vmem:[#allocation2 + $0x1f0] ss:$24 sps:$4 sm:$0xff]  }
  0x9c   :  { %1452 = vmatprep.subr.bf16.mxu1 %v4536_v8  ;;  %v4624_v8 = vld [vmem:[#allocation2 + $0x4f0] ss:$24 sps:$4 sm:$0xff]  }
  0x9e   :  { %1410 = vmatpush2.bf16.msra.mxu0 %v4531_v9  ;;  %v4629_v9 = vld [vmem:[#allocation2 + $0x1c4] ss:$24 sps:$4 sm:$0xff]  }
  0x9f   :  { %1453 = vmatpush2.bf16.msra.mxu1 %v4534_v10  ;;  %1411 = vmatprep.subr.bf16.mxu0 %v4539_v11  ;;  %v4632_v10 = vld [vmem:[#allocation2 + $0x4c4] ss:$24 sps:$4 sm:$0xff]   ;;  %v4627_v11 = vld [vmem:[#allocation2 + $0x1c0] ss:$24 sps:$4 sm:$0xff]  }
  0xa0   :  { %1454 = vmatprep.subr.bf16.mxu1 %v4542_v12  ;;  %v4630_v12 = vld [vmem:[#allocation2 + $0x4c0] ss:$24 sps:$4 sm:$0xff]  }
  0xa2   :  { %1412 = vmatpush2.bf16.msra.mxu0 %v4537_v15  ;;  %v4635_v15 = vld [vmem:[#allocation2 + $0x194] ss:$24 sps:$4 sm:$0xff]  }
  0xa3   :  { %1455 = vmatpush2.bf16.msra.mxu1 %v4540_v16  ;;  %1467 = vmatprep.subr.bf16.mxu0 %v4545_v17  ;;  %v4638_v16 = vld [vmem:[#allocation2 + $0x494] ss:$24 sps:$4 sm:$0xff]   ;;  %v4633_v17 = vld [vmem:[#allocation2 + $0x190] ss:$24 sps:$4 sm:$0xff]  }
  0xa4   :  { %1510 = vmatprep.subr.bf16.mxu1 %v4548_v18  ;;  %v4636_v18 = vld [vmem:[#allocation2 + $0x490] ss:$24 sps:$4 sm:$0xff]  }
  0xa5   :  { %1414 = vmatmul.mubr.bf16.vlgmr.msra.gmra.mxu0 %v5199_v13 }
  0xa6   :  { %1457 = vmatmul.mubr.bf16.vlgmr.msra.gmra.mxu1 %v5201_v14  ;;  %1468 = vmatpush1.bf16.msra.mxu0 %v4543_v19  ;;  %v261_v19 = vlaneseq }
  0xa7   :  { %1511 = vmatpush1.bf16.msra.mxu1 %v4546_v20  ;;  %1469 = vmatprep.subr.bf16.mxu0 %v4551_v21 }
  0xa8   :  { %1512 = vmatprep.subr.bf16.mxu1 %v4554_v22  ;;  %1499 = vmatprep.mubr.bf16.mxu0 %v5193_v59  ;;  %v4578_v59 = vld [vmem:[#allocation2 + $0x374] ss:$24 sps:$4 sm:$0xff]   ;;  %v5213_v21 = vshrl.u32 %v261_v19, 7 }
  0xa9   :  { %1542 = vmatprep.mubr.bf16.mxu1 %v5195_v60  ;;  %v4573_v60 = vld [vmem:[#allocation2 + $0x70] ss:$24 sps:$4 sm:$0xff]  }
  0xaa   :  { %1470 = vmatpush1.bf16.msra.mxu0 %v4549_v23 }
  0xab   :  { %1513 = vmatpush1.bf16.msra.mxu1 %v4552_v24  ;;  %1471 = vmatprep.subr.bf16.mxu0 %v4557_v25  ;;  %v263_v24 = vsub.s32 0, %v5213_v21  ;;  %v267_v25 = vsub.s32 2, %v5213_v21 }
  0xac   :  { %1514 = vmatprep.subr.bf16.mxu1 %v4560_v26 }
  0xae   :  { %1472 = vmatpush1.bf16.msra.mxu0 %v4555_v27  ;;  %v57_v27 = vld [vmem:[#allocation4] sm:$0xff] }
  0xaf   :  { %1515 = vmatpush1.bf16.msra.mxu1 %v4558_v28  ;;  %1473 = vmatprep.subr.bf16.mxu0 %v4563_v29  ;;  %v271_v29 = vsub.s32 4, %v5213_v21 }
  0xb0   :  { %1516 = vmatprep.subr.bf16.mxu1 %v4566_v30  ;;  %v264_v30 = vrot.slane %v57_v27, %v263_v24 }
  0xb2   :  { %1474 = vmatpush1.bf16.msra.mxu0 %v4561_v31  ;;  %v268_v31 = vrot.slane %v57_v27, %v267_v25 }
  0xb3   :  { %1517 = vmatpush1.bf16.msra.mxu1 %v4564_v32  ;;  %1475 = vmatprep.subr.bf16.mxu0 %v4569_v33  ;;  %v275_v33 = vsub.s32 6, %v5213_v21 }
  0xb4   :  { %1518 = vmatprep.subr.bf16.mxu1 %v4572_v34  ;;  %v294_v34 = vrot.slane %v264_v30, %v263_v24 }
  0xb6   :  { %1476 = vmatpush1.bf16.msra.mxu0 %v4567_v35  ;;  %v298_v35 = vrot.slane %v268_v31, %v263_v24 }
  0xb7   :  { %1519 = vmatpush1.bf16.msra.mxu1 %v4570_v36  ;;  %1477 = vmatprep.subr.bf16.mxu0 %v4575_v37 }
  0xb8   :  { %1520 = vmatprep.subr.bf16.mxu1 %v4578_v59 }
  0xba   :  { %1478 = vmatpush1.bf16.msra.mxu0 %v4573_v60 }
  0xbb   :  { %1521 = vmatpush1.bf16.msra.mxu1 %v4576_v38  ;;  %1479 = vmatprep.subr.bf16.mxu0 %v4581_v39  ;;  %v276_v38 = vrot.slane %v57_v27, %v275_v33  ;;  %v4641_v33 = vld [vmem:[#allocation6 + $0x154] ss:$24 sps:$4 sm:$0xff]  }
  0xbc   :  { %1522 = vmatprep.subr.bf16.mxu1 %v4584_v40 }
  0xbe   :  { %1480 = vmatpush1.bf16.msra.mxu0 %v4579_v41 }
  0xbf   :  { %1523 = vmatpush1.bf16.msra.mxu1 %v4582_v42  ;;  %1481 = vmatprep.subr.bf16.mxu0 %v4587_v43  ;;  %v306_v43 = vrot.slane %v276_v38, %v263_v24  ;;  %v4653_v38 = vld [vmem:[#allocation6 + $0xf4] ss:$24 sps:$4 sm:$0xff]  }
  0xc0   :  { %1524 = vmatprep.subr.bf16.mxu1 %v4590_v44 }
  0xc2   :  { %1482 = vmatpush1.bf16.msra.mxu0 %v4585_v45  ;;  %v58_v45 = vld [vmem:[#allocation4 + $0x8] sm:$0xf] }
  0xc3   :  { %1525 = vmatpush1.bf16.msra.mxu1 %v4588_v46  ;;  %1483 = vmatprep.subr.bf16.mxu0 %v4593_v47 }
  0xc4   :  { %1526 = vmatprep.subr.bf16.mxu1 %v4596_v48 }
  0xc6   :  { %1484 = vmatpush2.bf16.msra.mxu0 %v4591_v49 }
  0xc7   :  { %1527 = vmatpush2.bf16.msra.mxu1 %v4594_v50  ;;  %1485 = vmatprep.subr.bf16.mxu0 %v4599_v51  ;;  %v280_v50 = vrot.slane %v58_v45, %v263_v24 }
  0xc8   :  { %1528 = vmatprep.subr.bf16.mxu1 %v4602_v52 }
  0xca   :  { %1486 = vmatpush2.bf16.msra.mxu0 %v4597_v53 }
  0xcb   :  { %1529 = vmatpush2.bf16.msra.mxu1 %v4600_v54  ;;  %1487 = vmatprep.subr.bf16.mxu0 %v4605_v55 }
  0xcc   :  { %1530 = vmatprep.subr.bf16.mxu1 %v4608_v56  ;;  %v284_v56 = vrot.slane %v58_v45, %v267_v25  ;;  %v4660_v45 = vld [vmem:[#allocation6 + $0x3c0] ss:$24 sps:$4 sm:$0xff]  }
  0xce   :  { %1488 = vmatpush2.bf16.msra.mxu0 %v4603_v57 }
  0xcf   :  { %1531 = vmatpush2.bf16.msra.mxu1 %v4606_v58  ;;  %1489 = vmatprep.subr.bf16.mxu0 %v4611_v61 }
  0xd0   :  { %1532 = vmatprep.subr.bf16.mxu1 %v4614_v62  ;;  %v310_v62 = vrot.slane %v280_v50, %v263_v24  ;;  %v4663_v50 = vld [vmem:[#allocation6 + $0x90] ss:$24 sps:$4 sm:$0xff]  }
  0xd2   :  { %1490 = vmatpush2.bf16.msra.mxu0 %v4609_v63 }
  0xd3   :  { %1533 = vmatpush2.bf16.msra.mxu1 %v4612_v0  ;;  %1491 = vmatprep.subr.bf16.mxu0 %v4617_v1 }
  0xd4   :  { %1534 = vmatprep.subr.bf16.mxu1 %v4620_v2 }
  0xd6   :  { %1492 = vmatpush2.bf16.msra.mxu0 %v4615_v3 }
  0xd7   :  { %1535 = vmatpush2.bf16.msra.mxu1 %v4618_v4  ;;  %1493 = vmatprep.subr.bf16.mxu0 %v4623_v5  ;;  %v314_v5 = vrot.slane %v284_v56, %v263_v24  ;;  %v4672_v56 = vld [vmem:[#allocation6 + $0x360] ss:$24 sps:$4 sm:$0xff]  }
  0xd8   :  { %1536 = vmatprep.subr.bf16.mxu1 %v4626_v6 }
  0xda   :  { %1494 = vmatpush2.bf16.msra.mxu0 %v4621_v7 }
  0xdb   :  { %1537 = vmatpush2.bf16.msra.mxu1 %v4624_v8  ;;  %1495 = vmatprep.subr.bf16.mxu0 %v4629_v9 }
  0xdc   :  { %1538 = vmatprep.subr.bf16.mxu1 %v4632_v10 }
  0xde   :  { %1496 = vmatpush2.bf16.msra.mxu0 %v4627_v11 }
  0xdf   :  { %1539 = vmatpush2.bf16.msra.mxu1 %v4630_v12  ;;  %1497 = vmatprep.subr.bf16.mxu0 %v4635_v15 }
  0xe0   :  { %1540 = vmatprep.subr.bf16.mxu1 %v4638_v16 }
  0xe2   :  { %1498 = vmatpush2.bf16.msra.mxu0 %v4633_v17 }
  0xe3   :  { %1541 = vmatpush2.bf16.msra.mxu1 %v4636_v18  ;;  %3414 = vmatprep.subr.bf16.mxu0 %v4641_v33 }
  0xe5   :  { %1500 = vmatmul.mubr.bf16.vlgmr.msra.gmra.mxu0 %v5199_v13 }
  0xe6   :  { %1543 = vmatmul.mubr.bf16.vlgmr.msra.gmra.mxu1 %v5201_v14  ;;  %v272_v14 = vrot.slane %v57_v27, %v271_v29 }
  0xe8   :  { %v302_v59 = vrot.slane %v272_v14, %v263_v24  ;;  %v4639_v14 = vld [vmem:[#allocation6 + $0x150] ss:$24 sps:$4 sm:$0xff]  }
  0xe9   :  { %3415 = vmatpush1.bf16.msra.mxu0 %v4639_v14 }
 0x125   :  { %v1329_v20 = vpop.f32.mrf.mxu0 }
 0x126   :  { %v1372_v22 = vpop.f32.mrf.mxu1  ;;  %v1330_v39 = vadd.f32 %v1329_v20, %v294_v34 }
 0x127   :  { %v1331_v23 = vpop.f32.mrf.mxu0 }
 0x128   :  { %v1374_v26 = vpop.f32.mrf.mxu1  ;;  %v1332_v40 = vadd.f32 %v1331_v23, %v298_v35  ;;  %v5219_v46 = vadd.f32 %v1372_v22, %v1330_v39  ;;  %v4656_v39 = vld [vmem:[#allocation6 + $0x3f4] ss:$24 sps:$4 sm:$0xff]  }
 0x129   :  { %v1333_v28 = vpop.f32.mrf.mxu0 }
 0x12a   :  { %v1376_v13 = vpop.f32.mrf.mxu1  ;;  %v5221_v47 = vadd.f32 %v1374_v26, %v1332_v40  ;;  %v1334_v54 = vadd.f32 %v1333_v28, %v294_v34  ;;  %v4642_v34 = vld [vmem:[#allocation6 + $0x450] ss:$24 sps:$4 sm:$0xff]  }
 0x12b   :  { %v1335_v32 = vpop.f32.mrf.mxu0  ;;  %v4651_v40 = vld [vmem:[#allocation6 + $0xf0] ss:$24 sps:$4 sm:$0xff]  }
 0x12c   :  { %v1378_v36 = vpop.f32.mrf.mxu1  ;;  %v1336_v49 = vadd.f32 %v1335_v32, %v298_v35  ;;  %v1553_v57 = vadd.f32 %v5221_v47, %v5219_v46  ;;  %v5232_v2 = vadd.f32 %v1376_v13, %v1334_v54  ;;  %v4644_v35 = vld [vmem:[#allocation6 + $0x454] ss:$24 sps:$4 sm:$0xff]   ;;  %v4674_v54 = vld [vmem:[#allocation6 + $0x364] ss:$24 sps:$4 sm:$0xff]  }
 0x12d   :  { %3457 = vmatprep.subr.bf16.mxu1 %v4644_v35 }
 0x12e   :  { %v5227_v61 = vadd.f32 %v1378_v36, %v1336_v49  ;;  %v4647_v36 = vld [vmem:[#allocation6 + $0x124] ss:$24 sps:$4 sm:$0xff]   ;;  %3458 = vmatpush1.bf16.msra.mxu1 %v4642_v34  ;;  %v4668_v49 = vld [vmem:[#allocation6 + $0x394] ss:$24 sps:$4 sm:$0xff]  }
 0x12f   :  { %3416 = vmatprep.subr.bf16.mxu0 %v4647_v36 }
 0x130   :  { %v1560_v8 = vadd.f32 %v5227_v61, %v5232_v2 }
 0x165   :  { %v1415_v37 = vpop.f32.mrf.mxu0 }
 0x166   :  { %v1458_v60 = vpop.f32.mrf.mxu1  ;;  %v1416_v42 = vadd.f32 %v1415_v37, %v302_v59  ;;  %v4650_v37 = vld [vmem:[#allocation6 + $0x424] ss:$24 sps:$4 sm:$0xff]  }
 0x167   :  { %v1417_v41 = vpop.f32.mrf.mxu0  ;;  %3459 = vmatprep.subr.bf16.mxu1 %v4650_v37 }
 0x168   :  { %v1460_v44 = vpop.f32.mrf.mxu1  ;;  %v5223_v51 = vadd.f32 %v1458_v60, %v1416_v42  ;;  %v1418_v52 = vadd.f32 %v1417_v41, %v306_v43  ;;  %v4648_v60 = vld [vmem:[#allocation6 + $0x420] ss:$24 sps:$4 sm:$0xff]   ;;  %v4654_v41 = vld [vmem:[#allocation6 + $0x3f0] ss:$24 sps:$4 sm:$0xff]   ;;  %v4659_v42 = vld [vmem:[#allocation6 + $0xc4] ss:$24 sps:$4 sm:$0xff]  }
 0x169   :  { %v1419_v48 = vpop.f32.mrf.mxu0  ;;  %3460 = vmatpush1.bf16.msra.mxu1 %v4648_v60 }
 0x16a   :  { %v1462_v53 = vpop.f32.mrf.mxu1  ;;  %v1420_v55 = vadd.f32 %v1419_v48, %v302_v59  ;;  %v1554_v63 = vadd.f32 %v1553_v57, %v5223_v51  ;;  %v5230_v0 = vadd.f32 %v1460_v44, %v1418_v52  ;;  %v4645_v59 = vld [vmem:[#allocation6 + $0x120] ss:$24 sps:$4 sm:$0xff]   ;;  %3461 = vmatprep.subr.bf16.mxu1 %v4656_v39  ;;  %v4665_v48 = vld [vmem:[#allocation6 + $0x94] ss:$24 sps:$4 sm:$0xff]   ;;  %v4666_v52 = vld [vmem:[#allocation6 + $0x390] ss:$24 sps:$4 sm:$0xff]  }
 0x16b   :  { %v1421_v58 = vpop.f32.mrf.mxu0  ;;  %3417 = vmatpush1.bf16.msra.mxu0 %v4645_v59  ;;  %v4657_v44 = vld [vmem:[#allocation6 + $0xc0] ss:$24 sps:$4 sm:$0xff]   ;;  %v4677_v57 = vld [vmem:[#allocation6 + $0x34] ss:$24 sps:$4 sm:$0xff]  }
 0x16c   :  { %v1464_v1 = vpop.f32.mrf.mxu1  ;;  %v5234_v3 = vadd.f32 %v1462_v53, %v1420_v55  ;;  %v1422_v4 = vadd.f32 %v1421_v58, %v306_v43  ;;  %v1555_v10 = vadd.f32 %v1554_v63, %v5230_v0  ;;  %3418 = vmatprep.subr.bf16.mxu0 %v4653_v38  ;;  %v4662_v43 = vld [vmem:[#allocation6 + $0x3c4] ss:$24 sps:$4 sm:$0xff]   ;;  %v4669_v55 = vld [vmem:[#allocation6 + $0x60] ss:$24 sps:$4 sm:$0xff]   ;;  %v4680_v58 = vld [vmem:[#allocation6 + $0x334] ss:$24 sps:$4 sm:$0xff]  }
 0x16d   :  { %3462 = vmatpush1.bf16.msra.mxu1 %v4654_v41  ;;  %v4671_v53 = vld [vmem:[#allocation6 + $0x64] ss:$24 sps:$4 sm:$0xff]   ;;  %v4678_v63 = vld [vmem:[#allocation6 + $0x330] ss:$24 sps:$4 sm:$0xff]  }
 0x16e   :  { %v1561_v15 = vadd.f32 %v1560_v8, %v5234_v3  ;;  %v5240_v16 = vadd.f32 %v1464_v1, %v1422_v4  ;;  %3463 = vmatprep.subr.bf16.mxu1 %v4662_v43  ;;  %v4683_v1 = vld [vmem:[#allocation6 + $0x4] ss:$24 sps:$4 sm:$0xff]   ;;  %v4692_v8 = vld [vmem:[#allocation6 + $0x5d4] ss:$24 sps:$4 sm:$0xff]  }
 0x16f   :  { %3419 = vmatpush1.bf16.msra.mxu0 %v4651_v40  ;;  %v4686_v4 = vld [vmem:[#allocation6 + $0x304] ss:$24 sps:$4 sm:$0xff]  }
 0x170   :  { %v1562_v26 = vadd.f32 %v1561_v15, %v5240_v16  ;;  %3420 = vmatprep.subr.bf16.mxu0 %v4659_v42  ;;  %v4693_v15 = vld [vmem:[#allocation6 + $0x2a0] ss:$24 sps:$4 sm:$0xff]  }
 0x171   :  { %3464 = vmatpush1.bf16.msra.mxu1 %v4660_v45 }
 0x172   :  { %3465 = vmatprep.subr.bf16.mxu1 %v4668_v49  ;;  %v4704_v49 = vld [vmem:[#allocation6 + $0x574] ss:$24 sps:$4 sm:$0xff]  }
 0x173   :  { %3421 = vmatpush1.bf16.msra.mxu0 %v4657_v44 }
 0x174   :  { %3422 = vmatprep.subr.bf16.mxu0 %v4665_v48  ;;  %v4701_v48 = vld [vmem:[#allocation6 + $0x274] ss:$24 sps:$4 sm:$0xff]  }
 0x175   :  { %3466 = vmatpush1.bf16.msra.mxu1 %v4666_v52  ;;  %v4707_v52 = vld [vmem:[#allocation6 + $0x244] ss:$24 sps:$4 sm:$0xff]  }
 0x176   :  { %3467 = vmatprep.subr.bf16.mxu1 %v4674_v54  ;;  %v4705_v54 = vld [vmem:[#allocation6 + $0x240] ss:$24 sps:$4 sm:$0xff]  }
 0x177   :  { %3423 = vmatpush1.bf16.msra.mxu0 %v4663_v50  ;;  %v4702_v50 = vld [vmem:[#allocation6 + $0x570] ss:$24 sps:$4 sm:$0xff]  }
 0x178   :  { %3424 = vmatprep.subr.bf16.mxu0 %v4671_v53  ;;  %v4710_v53 = vld [vmem:[#allocation6 + $0x544] ss:$24 sps:$4 sm:$0xff]  }
 0x179   :  { %3468 = vmatpush1.bf16.msra.mxu1 %v4672_v56  ;;  %v4711_v56 = vld [vmem:[#allocation6 + $0x210] ss:$24 sps:$4 sm:$0xff]  }
 0x17a   :  { %3469 = vmatprep.subr.bf16.mxu1 %v4680_v58  ;;  %v4714_v58 = vld [vmem:[#allocation6 + $0x510] ss:$24 sps:$4 sm:$0xff]  }
 0x17b   :  { %3425 = vmatpush1.bf16.msra.mxu0 %v4669_v55  ;;  %v4708_v55 = vld [vmem:[#allocation6 + $0x540] ss:$24 sps:$4 sm:$0xff]  }
 0x17c   :  { %3426 = vmatprep.subr.bf16.mxu0 %v4677_v57  ;;  %v4713_v57 = vld [vmem:[#allocation6 + $0x214] ss:$24 sps:$4 sm:$0xff]  }
 0x17d   :  { %3470 = vmatpush1.bf16.msra.mxu1 %v4678_v63  ;;  %v4719_v63 = vld [vmem:[#allocation6 + $0x1e4] ss:$24 sps:$4 sm:$0xff]  }
 0x17e   :  { %3471 = vmatprep.subr.bf16.mxu1 %v4686_v4  ;;  %v4717_v4 = vld [vmem:[#allocation6 + $0x1e0] ss:$24 sps:$4 sm:$0xff]  }
 0x1a5   :  { %v1501_v6 = vpop.f32.mrf.mxu0 }
 0x1a6   :  { %v1544_v7 = vpop.f32.mrf.mxu1  ;;  %v1502_v9 = vadd.f32 %v1501_v6, %v310_v62  ;;  %v4684_v6 = vld [vmem:[#allocation6 + $0x300] ss:$24 sps:$4 sm:$0xff]  }
 0x1a7   :  { %v1503_v11 = vpop.f32.mrf.mxu0  ;;  %3472 = vmatpush1.bf16.msra.mxu1 %v4684_v6  ;;  %v4725_v6 = vld [vmem:[#allocation6 + $0x1b4] ss:$24 sps:$4 sm:$0xff]  }
 0x1a8   :  { %v1546_v12 = vpop.f32.mrf.mxu1  ;;  %v5242_v17 = vadd.f32 %v1544_v7, %v1502_v9  ;;  %v1504_v18 = vadd.f32 %v1503_v11, %v314_v5  ;;  %v4689_v7 = vld [vmem:[#allocation6 + $0x2d4] ss:$24 sps:$4 sm:$0xff]   ;;  %v4687_v9 = vld [vmem:[#allocation6 + $0x2d0] ss:$24 sps:$4 sm:$0xff]   ;;  %v4695_v11 = vld [vmem:[#allocation6 + $0x2a4] ss:$24 sps:$4 sm:$0xff]   ;;  %3473 = vmatprep.subr.bf16.mxu1 %v4692_v8 }
 0x1a9   :  { %v1505_v19 = vpop.f32.mrf.mxu0  ;;  %v4723_v8 = vld [vmem:[#allocation6 + $0x1b0] ss:$24 sps:$4 sm:$0xff]  }
 0x1aa   :  { %v1548_v20 = vpop.f32.mrf.mxu1  ;;  %v5244_v22 = vadd.f32 %v1546_v12, %v1504_v18  ;;  %v1506_v23 = vadd.f32 %v1505_v19, %v310_v62  ;;  %v1556_v24 = vadd.f32 %v1555_v10, %v5242_v17  ;;  %v4675_v62 = vld [vmem:[#allocation6 + $0x30] ss:$24 sps:$4 sm:$0xff]   ;;  %v4698_v12 = vld [vmem:[#allocation6 + $0x5a4] ss:$24 sps:$4 sm:$0xff]   ;;  %v4696_v18 = vld [vmem:[#allocation6 + $0x5a0] ss:$24 sps:$4 sm:$0xff]  }
 0x1ab   :  { %v1507_v25 = vpop.f32.mrf.mxu0  ;;  %3427 = vmatpush1.bf16.msra.mxu0 %v4675_v62  ;;  %v4690_v10 = vld [vmem:[#allocation6 + $0x5d0] ss:$24 sps:$4 sm:$0xff]   ;;  %v4716_v62 = vld [vmem:[#allocation6 + $0x514] ss:$24 sps:$4 sm:$0xff]  }
 0x1ac   :  { %v5248_v27 = vadd.f32 %v1548_v20, %v1506_v23  ;;  %v1508_v28 = vadd.f32 %v1507_v25, %v314_v5  ;;  %v1557_v29 = vadd.f32 %v1556_v24, %v5244_v22  ;;  %v1550_v30 = vpop.f32.mrf.mxu1  ;;  %v4681_v5 = vld [vmem:[#allocation6] ss:$24 sps:$4 sm:$0xff]   ;;  %3428 = vmatprep.subr.bf16.mxu0 %v4683_v1  ;;  %3474 = vmatpush2.bf16.msra.mxu1 %v4690_v10  ;;  %v4722_v1 = vld [vmem:[#allocation6 + $0x4e4] ss:$24 sps:$4 sm:$0xff]  }
 0x1ad   :  { %3475 = vmatprep.subr.bf16.mxu1 %v4698_v12  ;;  %v4731_v10 = vld [vmem:[#allocation6 + $0x184] ss:$24 sps:$4 sm:$0xff]   ;;  %v4729_v12 = vld [vmem:[#allocation6 + $0x180] ss:$24 sps:$4 sm:$0xff]  }
 0x1ae   :  { %v1563_v31 = vadd.f32 %v1562_v26, %v5248_v27  ;;  %v5252_v13 = vadd.f32 %v1550_v30, %v1508_v28  ;;  %1558 = vadd.xlane.f32.xlu0 %v1557_v29 }
 0x1af   :  { %3429 = vmatpush1.bf16.msra.mxu0 %v4681_v5  ;;  %v4720_v5 = vld [vmem:[#allocation6 + $0x4e0] ss:$24 sps:$4 sm:$0xff]  }
 0x1b0   :  { %v1564_v32 = vadd.f32 %v1563_v31, %v5252_v13  ;;  %3430 = vmatprep.subr.bf16.mxu0 %v4689_v7  ;;  %3476 = vmatpush2.bf16.msra.mxu1 %v4696_v18  ;;  %v4728_v7 = vld [vmem:[#allocation6 + $0x4b4] ss:$24 sps:$4 sm:$0xff]  }
 0x1b1   :  { %3477 = vmatprep.subr.bf16.mxu1 %v4704_v49  ;;  %v4737_v18 = vld [vmem:[#allocation6 + $0x754] ss:$24 sps:$4 sm:$0xff]   ;;  %v4753_v49 = vld [vmem:[#allocation6 + $0x6c0] ss:$24 sps:$4 sm:$0xff]  }
 0x1b2   :  { %1565 = vadd.xlane.f32.xlu0 %v1564_v32 }
 0x1b3   :  { %3431 = vmatpush2.bf16.msra.mxu0 %v4687_v9  ;;  %v4726_v9 = vld [vmem:[#allocation6 + $0x4b0] ss:$24 sps:$4 sm:$0xff]  }
 0x1b4   :  { %3432 = vmatprep.subr.bf16.mxu0 %v4695_v11  ;;  %3478 = vmatpush2.bf16.msra.mxu1 %v4702_v50  ;;  %v4734_v11 = vld [vmem:[#allocation6 + $0x484] ss:$24 sps:$4 sm:$0xff]   ;;  %v4761_v50 = vld [vmem:[#allocation6 + $0x694] ss:$24 sps:$4 sm:$0xff]  }
 0x1b5   :  { %3479 = vmatprep.subr.bf16.mxu1 %v4710_v53  ;;  %v4759_v53 = vld [vmem:[#allocation6 + $0x690] ss:$24 sps:$4 sm:$0xff]  }
 0x1b7   :  { %3433 = vmatpush2.bf16.msra.mxu0 %v4693_v15  ;;  %v4732_v15 = vld [vmem:[#allocation6 + $0x480] ss:$24 sps:$4 sm:$0xff]  }
 0x1b8   :  { %3434 = vmatprep.subr.bf16.mxu0 %v4701_v48  ;;  %3480 = vmatpush2.bf16.msra.mxu1 %v4708_v55  ;;  %v4758_v48 = vld [vmem:[#allocation6 + $0xcc] ss:$24 sps:$4 sm:$0xff]  }
 0x1b9   :  { %3481 = vmatprep.subr.bf16.mxu1 %v4716_v62  ;;  %v4767_v55 = vld [vmem:[#allocation6 + $0x664] ss:$24 sps:$4 sm:$0xff]   ;;  %v4773_v62 = vld [vmem:[#allocation6 + $0x634] ss:$24 sps:$4 sm:$0xff]  }
 0x1bc   :  { %3482 = vmatpush2.bf16.msra.mxu1 %v4714_v58  ;;  %v4768_v58 = vld [vmem:[#allocation6 + $0x68] ss:$24 sps:$4 sm:$0xff]  }
 0x1bd   :  { %3483 = vmatprep.subr.bf16.mxu1 %v4722_v1  ;;  %v4771_v1 = vld [vmem:[#allocation6 + $0x630] ss:$24 sps:$4 sm:$0xff]  }
 0x1c0   :  { %3484 = vmatpush2.bf16.msra.mxu1 %v4720_v5  ;;  %v4779_v5 = vld [vmem:[#allocation6 + $0x604] ss:$24 sps:$4 sm:$0xff]  }
 0x1c1   :  { %3485 = vmatprep.subr.bf16.mxu1 %v4728_v7  ;;  %v4777_v7 = vld [vmem:[#allocation6 + $0x600] ss:$24 sps:$4 sm:$0xff]  }
 0x1c4   :  { %3486 = vmatpush2.bf16.msra.mxu1 %v4726_v9  ;;  %v4785_v9 = vld [vmem:[#allocation6 + $0x8d4] ss:$24 sps:$4 sm:$0xff]  }
 0x1c5   :  { %3487 = vmatprep.subr.bf16.mxu1 %v4734_v11  ;;  %v4783_v11 = vld [vmem:[#allocation6 + $0x8d0] ss:$24 sps:$4 sm:$0xff]  }
 0x1c8   :  { %3488 = vmatpush2.bf16.msra.mxu1 %v4732_v15  ;;  %v4791_v15 = vld [vmem:[#allocation6 + $0x8a4] ss:$24 sps:$4 sm:$0xff]  }
 0x237   :  { %v1559_v19 = vpop.xlane.xlu0 %1558 }
 0x238   :  { %v1568_v20 = vmul.f32 0.0013020834, %v1559_v19  ;;  %v4740_v19 = vld [vmem:[#allocation6 + $0x15c] ss:$24 sps:$4 sm:$0xff]  }
 0x239   :  { %3543 = vmatprep.subr.bf16.mxu1 %v4740_v19  ;;  %v4789_v19 = vld [vmem:[#allocation6 + $0x8a0] ss:$24 sps:$4 sm:$0xff]  }
 0x23a   :  { %v5256_v23 = vsub.f32 %v5219_v46, %v1568_v20  ;;  %v5259_v24 = vsub.f32 %v5221_v47, %v1568_v20  ;;  %v5262_v25 = vsub.f32 %v5223_v51, %v1568_v20  ;;  %v5265_v28 = vsub.f32 %v5230_v0, %v1568_v20 }
 0x23b   :  { %v1566_v26 = vpop.xlane.xlu0 %1565  ;;  %v5272_v46 = vsub.f32 %v5242_v17, %v1568_v20  ;;  %v5286_v33 = vsub.f32 %v5244_v22, %v1568_v20 }
 0x23c   :  { %v1569_v29 = vmul.f32 0.0013020834, %v1566_v26  ;;  %v1582_v30 = vmul.f32 %v5256_v23, %v5256_v23  ;;  %v1583_v31 = vmul.f32 %v5259_v24, %v5259_v24  ;;  %v1584_v47 = vmul.f32 %v5262_v25, %v5262_v25 }
 0x23d   :  { %v1585_v17 = vmul.f32 %v5265_v28, %v5265_v28 }
 0x23e   :  { %v1594_v32 = vadd.f32 %v1583_v31, %v1582_v30  ;;  %v5277_v51 = vsub.f32 %v5232_v2, %v1569_v29  ;;  %v5280_v0 = vsub.f32 %v5227_v61, %v1569_v29  ;;  %v5283_v14 = vsub.f32 %v5234_v3, %v1569_v29 }
 0x23f   :  { %v5291_v35 = vsub.f32 %v5240_v16, %v1569_v29  ;;  %v1586_v3 = vmul.f32 %v5272_v46, %v5272_v46  ;;  %v5300_v22 = vsub.f32 %v5248_v27, %v1569_v29  ;;  %v1587_v16 = vmul.f32 %v5286_v33, %v5286_v33 }
 0x240   :  { %v1595_v34 = vadd.f32 %v1594_v32, %v1584_v47  ;;  %v1588_v2 = vmul.f32 %v5277_v51, %v5277_v51  ;;  %v1589_v61 = vmul.f32 %v5280_v0, %v5280_v0  ;;  %v1590_v37 = vmul.f32 %v5283_v14, %v5283_v14 }
 0x241   :  { %v5307_v38 = vsub.f32 %v5252_v13, %v1569_v29  ;;  %v1591_v39 = vmul.f32 %v5291_v35, %v5291_v35  ;;  %v1592_v27 = vmul.f32 %v5300_v22, %v5300_v22  ;;  %v4699_v13 = vld [vmem:[#allocation6 + $0x270] ss:$24 sps:$4 sm:$0xff]  }
 0x242   :  { %v1596_v36 = vadd.f32 %v1595_v34, %v1585_v17  ;;  %v1601_v59 = vadd.f32 %v1589_v61, %v1588_v2  ;;  %3435 = vmatpush2.bf16.msra.mxu0 %v4699_v13  ;;  %v4756_v13 = vld [vmem:[#allocation6 + $0xc8] ss:$24 sps:$4 sm:$0xff]  }
 0x243   :  { %v1593_v43 = vmul.f32 %v5307_v38, %v5307_v38  ;;  %3436 = vmatprep.subr.bf16.mxu0 %v4707_v52  ;;  %v4764_v52 = vld [vmem:[#allocation6 + $0x9c] ss:$24 sps:$4 sm:$0xff]  }
 0x244   :  { %v1597_v60 = vadd.f32 %v1596_v36, %v1586_v3  ;;  %v1602_v40 = vadd.f32 %v1601_v59, %v1590_v37 }
 0x246   :  { %v1598_v41 = vadd.f32 %v1597_v60, %v1587_v16  ;;  %v1603_v42 = vadd.f32 %v1602_v40, %v1591_v39  ;;  %3437 = vmatpush2.bf16.msra.mxu0 %v4705_v54  ;;  %v4762_v54 = vld [vmem:[#allocation6 + $0x98] ss:$24 sps:$4 sm:$0xff]  }
 0x247   :  { %3438 = vmatprep.subr.bf16.mxu0 %v4713_v57  ;;  %v4765_v57 = vld [vmem:[#allocation6 + $0x660] ss:$24 sps:$4 sm:$0xff]  }
 0x248   :  { %1599 = vadd.xlane.f32.xlu1 %v1598_v41  ;;  %v1604_v44 = vadd.f32 %v1603_v42, %v1592_v27  ;;  %v4744_v27 = vld [vmem:[#allocation6 + $0x128] ss:$24 sps:$4 sm:$0xff]   ;;  %v4752_v42 = vld [vmem:[#allocation6 + $0xfc] ss:$24 sps:$4 sm:$0xff]  }
 0x24a   :  { %v1605_v45 = vadd.f32 %v1604_v44, %v1593_v43  ;;  %3439 = vmatpush2.bf16.msra.mxu0 %v4711_v56  ;;  %v4747_v43 = vld [vmem:[#allocation6 + $0x6f0] ss:$24 sps:$4 sm:$0xff]   ;;  %v4770_v56 = vld [vmem:[#allocation6 + $0x6c] ss:$24 sps:$4 sm:$0xff]  }
 0x24b   :  { %3440 = vmatprep.subr.bf16.mxu0 %v4719_v63  ;;  %v4750_v44 = vld [vmem:[#allocation6 + $0xf8] ss:$24 sps:$4 sm:$0xff]   ;;  %v4776_v63 = vld [vmem:[#allocation6 + $0x3c] ss:$24 sps:$4 sm:$0xff]  }
 0x24c   :  { %1606 = vadd.xlane.f32.xlu1 %v1605_v45  ;;  %v4755_v45 = vld [vmem:[#allocation6 + $0x6c4] ss:$24 sps:$4 sm:$0xff]  }
 0x24e   :  { %3441 = vmatpush2.bf16.msra.mxu0 %v4717_v4  ;;  %v4774_v4 = vld [vmem:[#allocation6 + $0x38] ss:$24 sps:$4 sm:$0xff]  }
 0x24f   :  { %3442 = vmatprep.subr.bf16.mxu0 %v4725_v6  ;;  %v4782_v6 = vld [vmem:[#allocation6 + $0xc] ss:$24 sps:$4 sm:$0xff]  }
 0x252   :  { %3443 = vmatpush2.bf16.msra.mxu0 %v4723_v8  ;;  %v4780_v8 = vld [vmem:[#allocation6 + $0x8] ss:$24 sps:$4 sm:$0xff]  }
 0x253   :  { %3444 = vmatprep.subr.bf16.mxu0 %v4731_v10  ;;  %v4788_v10 = vld [vmem:[#allocation6 + $0x2dc] ss:$24 sps:$4 sm:$0xff]  }
 0x256   :  { %3445 = vmatpush2.bf16.msra.mxu0 %v4729_v12  ;;  %v4786_v12 = vld [vmem:[#allocation6 + $0x2d8] ss:$24 sps:$4 sm:$0xff]  }
 0x257   :  { %3500 = vmatprep.subr.bf16.mxu0 %v4737_v18  ;;  %v4794_v18 = vld [vmem:[#allocation6 + $0x2ac] ss:$24 sps:$4 sm:$0xff]  }
 0x2d1   :  { %v1600_v20 = vpop.xlane.xlu1 %1599 }
 0x2d2   :  { %v1608_v26 = vmul.f32 0.0013020834, %v1600_v20  ;;  %v4792_v20 = vld [vmem:[#allocation6 + $0x2a8] ss:$24 sps:$4 sm:$0xff]  }
 0x2d4   :  { %v1610_v29 = vadd.f32 1e-05, %v1608_v26  ;;  %v4797_v26 = vld [vmem:[#allocation6 + $0x874] ss:$24 sps:$4 sm:$0xff]  }
 0x2d5   :  { %v1607_v30 = vpop.xlane.xlu1 %1606 }
 0x2d6   :  { %v1609_v31 = vmul.f32 0.0013020834, %v1607_v30  ;;  %5071 = vrsqrt.f32 %v1610_v29  ;;  %v4800_v29 = vld [vmem:[#allocation6 + $0x27c] ss:$24 sps:$4 sm:$0xff]   ;;  %v4795_v30 = vld [vmem:[#allocation6 + $0x870] ss:$24 sps:$4 sm:$0xff]  }
 0x2d8   :  { %v1611_v47 = vadd.f32 1e-05, %v1609_v31  ;;  %v4798_v31 = vld [vmem:[#allocation6 + $0x278] ss:$24 sps:$4 sm:$0xff]  }
 0x2da   :  { %5073 = vrsqrt.f32 %v1611_v47  ;;  %v4803_v47 = vld [vmem:[#allocation6 + $0x844] ss:$24 sps:$4 sm:$0xff]  }
 0x2e3   :  { %v5072_v32 = vpop.eup %5071 }
 0x2e4   :  { %v1615_v34 = vmul.f32 %v5072_v32, %v5259_v24  ;;  %v1617_v2 = vmul.f32 %v5072_v32, %v5265_v28  ;;  %v1614_v61 = vmul.f32 %v5072_v32, %v5256_v23  ;;  %v1616_v3 = vmul.f32 %v5072_v32, %v5262_v25  ;;  %v4735_v23 = vld [vmem:[#allocation6 + $0x750] ss:$24 sps:$4 sm:$0xff]  }
 0x2e5   :  { %v1618_v39 = vmul.f32 %v5072_v32, %v5272_v46  ;;  %v4738_v25 = vld [vmem:[#allocation6 + $0x158] ss:$24 sps:$4 sm:$0xff]   ;;  %v4743_v46 = vld [vmem:[#allocation6 + $0x724] ss:$24 sps:$4 sm:$0xff]  }
 0x2e7   :  { %v5074_v17 = vpop.eup %5073 }
 0x2e8   :  { %v1621_v36 = vmul.f32 %v5074_v17, %v5280_v0  ;;  %v1623_v37 = vmul.f32 %v5074_v17, %v5291_v35  ;;  %v1620_v59 = vmul.f32 %v5074_v17, %v5277_v51  ;;  %v1622_v16 = vmul.f32 %v5074_v17, %v5283_v14  ;;  %v4746_v14 = vld [vmem:[#allocation6 + $0x12c] ss:$24 sps:$4 sm:$0xff]  }
 0x2e9   :  { %v1625_v60 = vmul.f32 %v5074_v17, %v5307_v38  ;;  %v1624_v24 = vmul.f32 %v5074_v17, %v5300_v22  ;;  %v1619_v51 = vmul.f32 %v5072_v32, %v5286_v33  ;;  %v4741_v38 = vld [vmem:[#allocation6 + $0x720] ss:$24 sps:$4 sm:$0xff]   ;;  %v4749_v33 = vld [vmem:[#allocation6 + $0x6f4] ss:$24 sps:$4 sm:$0xff]  }
 0x2ea   :  { %v5326_v40 = vpack.c.bf16 %v1621_v36, %v1615_v34  ;;  %v5328_v28 = vpack.c.bf16 %v1623_v37, %v1617_v2  ;;  %v5330_v41 = vpack.c.bf16 %v1620_v59, %v1614_v61  ;;  %v5332_v0 = vpack.c.bf16 %v1622_v16, %v1616_v3  ;;  %v4806_v32 = vld [vmem:[#allocation6 + $0x24c] ss:$24 sps:$4 sm:$0xff]   ;;  %v4801_v17 = vld [vmem:[#allocation6 + $0x840] ss:$24 sps:$4 sm:$0xff]   ;;  %v4812_v61 = vld [vmem:[#allocation6 + $0x21c] ss:$24 sps:$4 sm:$0xff]  }
 0x2eb   :  { %v5335_v35 = vpack.c.bf16 %v1624_v24, %v1618_v39  ;;  %v5341_v22 = vpack.c.bf16 %v1625_v60, %v1619_v51  ;;  %v4804_v34 = vld [vmem:[#allocation6 + $0x248] ss:$24 sps:$4 sm:$0xff]   ;;  %v4809_v2 = vld [vmem:[#allocation6 + $0x814] ss:$24 sps:$4 sm:$0xff]   ;;  %v4810_v36 = vld [vmem:[#allocation6 + $0x218] ss:$24 sps:$4 sm:$0xff]  }
 0x2ec   :  { %3446 = vmatprep.mubr.bf16.mxu0 %v5326_v40  ;;  %3489 = vmatprep.mubr.bf16.mxu1 %v5328_v28  ;;  %v4807_v3 = vld [vmem:[#allocation6 + $0x810] ss:$24 sps:$4 sm:$0xff]   ;;  %v4815_v37 = vld [vmem:[#allocation6 + $0x7e4] ss:$24 sps:$4 sm:$0xff]   ;;  %v4813_v16 = vld [vmem:[#allocation6 + $0x7e0] ss:$24 sps:$4 sm:$0xff]  }
 0x2ed   :  { %3447 = vmatmul.mubr.bf16.vlgmr.msra.gmra.mxu0 %v5330_v41  ;;  %3490 = vmatmul.mubr.bf16.vlgmr.msra.gmra.mxu1 %v5332_v0  ;;  %v4818_v59 = vld [vmem:[#allocation6 + $0x1ec] ss:$24 sps:$4 sm:$0xff]   ;;  %v4816_v60 = vld [vmem:[#allocation6 + $0x1e8] ss:$24 sps:$4 sm:$0xff]   ;;  %v4824_v24 = vld [vmem:[#allocation6 + $0x1bc] ss:$24 sps:$4 sm:$0xff]  }
 0x2ee   :  { %3501 = vmatpush1.bf16.msra.mxu0 %v4735_v23  ;;  %3544 = vmatpush1.bf16.msra.mxu1 %v4738_v25  ;;  %v4821_v39 = vld [vmem:[#allocation6 + $0x7b4] ss:$24 sps:$4 sm:$0xff]   ;;  %v4819_v23 = vld [vmem:[#allocation6 + $0x7b0] ss:$24 sps:$4 sm:$0xff]   ;;  %v4827_v51 = vld [vmem:[#allocation6 + $0x784] ss:$24 sps:$4 sm:$0xff]  }
 0x2ef   :  { %3532 = vmatprep.mubr.bf16.mxu0 %v5341_v22  ;;  %3575 = vmatprep.mubr.bf16.mxu1 %v5326_v40  ;;  %v4822_v25 = vld [vmem:[#allocation6 + $0x1b8] ss:$24 sps:$4 sm:$0xff]  }
 0x2f0   :  { %3502 = vmatprep.subr.bf16.mxu0 %v4743_v46  ;;  %3545 = vmatprep.subr.bf16.mxu1 %v4746_v14  ;;  %v4830_v46 = vld [vmem:[#allocation6 + $0x18c] ss:$24 sps:$4 sm:$0xff]   ;;  %v4825_v14 = vld [vmem:[#allocation6 + $0x780] ss:$24 sps:$4 sm:$0xff]  }
 0x2f2   :  { %3503 = vmatpush1.bf16.msra.mxu0 %v4741_v38  ;;  %3546 = vmatpush1.bf16.msra.mxu1 %v4744_v27  ;;  %v4828_v38 = vld [vmem:[#allocation6 + $0x188] ss:$24 sps:$4 sm:$0xff]   ;;  %v4833_v27 = vld [vmem:[#allocation6 + $0x45c] ss:$24 sps:$4 sm:$0xff]  }
 0x2f3   :  { %3504 = vmatprep.subr.bf16.mxu0 %v4749_v33  ;;  %3547 = vmatprep.subr.bf16.mxu1 %v4752_v42  ;;  %v4836_v33 = vld [vmem:[#allocation6 + $0x75c] ss:$24 sps:$4 sm:$0xff]   ;;  %v4831_v42 = vld [vmem:[#allocation6 + $0x458] ss:$24 sps:$4 sm:$0xff]  }
 0x2f6   :  { %3505 = vmatpush1.bf16.msra.mxu0 %v4747_v43  ;;  %3548 = vmatpush1.bf16.msra.mxu1 %v4750_v44  ;;  %v4834_v43 = vld [vmem:[#allocation6 + $0x758] ss:$24 sps:$4 sm:$0xff]   ;;  %v4839_v44 = vld [vmem:[#allocation6 + $0x42c] ss:$24 sps:$4 sm:$0xff]  }
 0x2f7   :  { %3506 = vmatprep.subr.bf16.mxu0 %v4755_v45  ;;  %3549 = vmatprep.subr.bf16.mxu1 %v4758_v48  ;;  %v4842_v45 = vld [vmem:[#allocation6 + $0x72c] ss:$24 sps:$4 sm:$0xff]   ;;  %v4837_v48 = vld [vmem:[#allocation6 + $0x428] ss:$24 sps:$4 sm:$0xff]  }
 0x2fa   :  { %3507 = vmatpush1.bf16.msra.mxu0 %v4753_v49  ;;  %3550 = vmatpush1.bf16.msra.mxu1 %v4756_v13  ;;  %v4840_v49 = vld [vmem:[#allocation6 + $0x728] ss:$24 sps:$4 sm:$0xff]   ;;  %v4845_v13 = vld [vmem:[#allocation6 + $0x3fc] ss:$24 sps:$4 sm:$0xff]  }
 0x2fb   :  { %3508 = vmatprep.subr.bf16.mxu0 %v4761_v50  ;;  %3551 = vmatprep.subr.bf16.mxu1 %v4764_v52  ;;  %v4848_v50 = vld [vmem:[#allocation6 + $0x6fc] ss:$24 sps:$4 sm:$0xff]   ;;  %v4843_v52 = vld [vmem:[#allocation6 + $0x3f8] ss:$24 sps:$4 sm:$0xff]  }
 0x2fe   :  { %3509 = vmatpush1.bf16.msra.mxu0 %v4759_v53  ;;  %3552 = vmatpush1.bf16.msra.mxu1 %v4762_v54  ;;  %v4846_v53 = vld [vmem:[#allocation6 + $0x6f8] ss:$24 sps:$4 sm:$0xff]   ;;  %v4851_v54 = vld [vmem:[#allocation6 + $0x3cc] ss:$24 sps:$4 sm:$0xff]  }
 0x2ff   :  { %3510 = vmatprep.subr.bf16.mxu0 %v4767_v55  ;;  %3553 = vmatprep.subr.bf16.mxu1 %v4770_v56  ;;  %v4854_v55 = vld [vmem:[#allocation6 + $0x6cc] ss:$24 sps:$4 sm:$0xff]   ;;  %v4849_v56 = vld [vmem:[#allocation6 + $0x3c8] ss:$24 sps:$4 sm:$0xff]  }
 0x302   :  { %3511 = vmatpush1.bf16.msra.mxu0 %v4765_v57  ;;  %3554 = vmatpush1.bf16.msra.mxu1 %v4768_v58  ;;  %v4852_v57 = vld [vmem:[#allocation6 + $0x6c8] ss:$24 sps:$4 sm:$0xff]   ;;  %v4857_v58 = vld [vmem:[#allocation6 + $0x39c] ss:$24 sps:$4 sm:$0xff]  }
 0x303   :  { %3512 = vmatprep.subr.bf16.mxu0 %v4773_v62  ;;  %3555 = vmatprep.subr.bf16.mxu1 %v4776_v63  ;;  %v4860_v62 = vld [vmem:[#allocation6 + $0x69c] ss:$24 sps:$4 sm:$0xff]   ;;  %v4855_v63 = vld [vmem:[#allocation6 + $0x398] ss:$24 sps:$4 sm:$0xff]  }
 0x306   :  { %3513 = vmatpush1.bf16.msra.mxu0 %v4771_v1  ;;  %3556 = vmatpush1.bf16.msra.mxu1 %v4774_v4  ;;  %v4858_v1 = vld [vmem:[#allocation6 + $0x698] ss:$24 sps:$4 sm:$0xff]   ;;  %v4863_v4 = vld [vmem:[#allocation6 + $0x36c] ss:$24 sps:$4 sm:$0xff]  }
 0x307   :  { %3514 = vmatprep.subr.bf16.mxu0 %v4779_v5  ;;  %3557 = vmatprep.subr.bf16.mxu1 %v4782_v6  ;;  %v4866_v5 = vld [vmem:[#allocation6 + $0x66c] ss:$24 sps:$4 sm:$0xff]   ;;  %v4861_v6 = vld [vmem:[#allocation6 + $0x368] ss:$24 sps:$4 sm:$0xff]  }
 0x30a   :  { %3515 = vmatpush1.bf16.msra.mxu0 %v4777_v7  ;;  %3558 = vmatpush1.bf16.msra.mxu1 %v4780_v8  ;;  %v4864_v7 = vld [vmem:[#allocation6 + $0x668] ss:$24 sps:$4 sm:$0xff]   ;;  %v4869_v8 = vld [vmem:[#allocation6 + $0x33c] ss:$24 sps:$4 sm:$0xff]  }
 0x30b   :  { %3516 = vmatprep.subr.bf16.mxu0 %v4785_v9  ;;  %3559 = vmatprep.subr.bf16.mxu1 %v4788_v10  ;;  %v4872_v9 = vld [vmem:[#allocation6 + $0x63c] ss:$24 sps:$4 sm:$0xff]   ;;  %v4867_v10 = vld [vmem:[#allocation6 + $0x338] ss:$24 sps:$4 sm:$0xff]  }
 0x30e   :  { %3517 = vmatpush2.bf16.msra.mxu0 %v4783_v11  ;;  %3560 = vmatpush2.bf16.msra.mxu1 %v4786_v12  ;;  %v4870_v11 = vld [vmem:[#allocation6 + $0x638] ss:$24 sps:$4 sm:$0xff]   ;;  %v4875_v12 = vld [vmem:[#allocation6 + $0x30c] ss:$24 sps:$4 sm:$0xff]  }
 0x30f   :  { %3518 = vmatprep.subr.bf16.mxu0 %v4791_v15  ;;  %3561 = vmatprep.subr.bf16.mxu1 %v4794_v18  ;;  %v4878_v15 = vld [vmem:[#allocation6 + $0x60c] ss:$24 sps:$4 sm:$0xff]   ;;  %v4873_v18 = vld [vmem:[#allocation6 + $0x308] ss:$24 sps:$4 sm:$0xff]  }
 0x312   :  { %3519 = vmatpush2.bf16.msra.mxu0 %v4789_v19  ;;  %3562 = vmatpush2.bf16.msra.mxu1 %v4792_v20  ;;  %v4876_v19 = vld [vmem:[#allocation6 + $0x608] ss:$24 sps:$4 sm:$0xff]   ;;  %v4881_v20 = vld [vmem:[#allocation6 + $0x5dc] ss:$24 sps:$4 sm:$0xff]  }
 0x313   :  { %3520 = vmatprep.subr.bf16.mxu0 %v4797_v26  ;;  %3563 = vmatprep.subr.bf16.mxu1 %v4800_v29  ;;  %v4884_v26 = vld [vmem:[#allocation6 + $0x8dc] ss:$24 sps:$4 sm:$0xff]   ;;  %v4879_v29 = vld [vmem:[#allocation6 + $0x5d8] ss:$24 sps:$4 sm:$0xff]  }
 0x316   :  { %3521 = vmatpush2.bf16.msra.mxu0 %v4795_v30  ;;  %3564 = vmatpush2.bf16.msra.mxu1 %v4798_v31  ;;  %v4882_v30 = vld [vmem:[#allocation6 + $0x8d8] ss:$24 sps:$4 sm:$0xff]   ;;  %v4887_v31 = vld [vmem:[#allocation6 + $0x5ac] ss:$24 sps:$4 sm:$0xff]  }
 0x317   :  { %3522 = vmatprep.subr.bf16.mxu0 %v4803_v47  ;;  %3565 = vmatprep.subr.bf16.mxu1 %v4806_v32  ;;  %v4890_v47 = vld [vmem:[#allocation6 + $0x8ac] ss:$24 sps:$4 sm:$0xff]   ;;  %v4885_v32 = vld [vmem:[#allocation6 + $0x5a8] ss:$24 sps:$4 sm:$0xff]  }
 0x31a   :  { %3523 = vmatpush2.bf16.msra.mxu0 %v4801_v17  ;;  %3566 = vmatpush2.bf16.msra.mxu1 %v4804_v34  ;;  %v4888_v17 = vld [vmem:[#allocation6 + $0x8a8] ss:$24 sps:$4 sm:$0xff]   ;;  %v4893_v34 = vld [vmem:[#allocation6 + $0x57c] ss:$24 sps:$4 sm:$0xff]  }
 0x31b   :  { %3524 = vmatprep.subr.bf16.mxu0 %v4809_v2  ;;  %3567 = vmatprep.subr.bf16.mxu1 %v4812_v61  ;;  %v4896_v2 = vld [vmem:[#allocation6 + $0x87c] ss:$24 sps:$4 sm:$0xff]   ;;  %v4891_v61 = vld [vmem:[#allocation6 + $0x578] ss:$24 sps:$4 sm:$0xff]  }
 0x31e   :  { %3525 = vmatpush2.bf16.msra.mxu0 %v4807_v3  ;;  %3568 = vmatpush2.bf16.msra.mxu1 %v4810_v36  ;;  %v4894_v3 = vld [vmem:[#allocation6 + $0x878] ss:$24 sps:$4 sm:$0xff]   ;;  %v4899_v36 = vld [vmem:[#allocation6 + $0x54c] ss:$24 sps:$4 sm:$0xff]  }
 0x31f   :  { %3526 = vmatprep.subr.bf16.mxu0 %v4815_v37  ;;  %3569 = vmatprep.subr.bf16.mxu1 %v4818_v59  ;;  %v4902_v37 = vld [vmem:[#allocation6 + $0x84c] ss:$24 sps:$4 sm:$0xff]   ;;  %v4897_v59 = vld [vmem:[#allocation6 + $0x548] ss:$24 sps:$4 sm:$0xff]  }
 0x322   :  { %3527 = vmatpush2.bf16.msra.mxu0 %v4813_v16  ;;  %3570 = vmatpush2.bf16.msra.mxu1 %v4816_v60  ;;  %v4900_v16 = vld [vmem:[#allocation6 + $0x848] ss:$24 sps:$4 sm:$0xff]   ;;  %v4905_v60 = vld [vmem:[#allocation6 + $0x51c] ss:$24 sps:$4 sm:$0xff]  }
 0x323   :  { %3528 = vmatprep.subr.bf16.mxu0 %v4821_v39  ;;  %3571 = vmatprep.subr.bf16.mxu1 %v4824_v24  ;;  %v4908_v39 = vld [vmem:[#allocation6 + $0x81c] ss:$24 sps:$4 sm:$0xff]   ;;  %v4903_v24 = vld [vmem:[#allocation6 + $0x518] ss:$24 sps:$4 sm:$0xff]  }
 0x326   :  { %3529 = vmatpush2.bf16.msra.mxu0 %v4819_v23  ;;  %3572 = vmatpush2.bf16.msra.mxu1 %v4822_v25  ;;  %v4906_v23 = vld [vmem:[#allocation6 + $0x818] ss:$24 sps:$4 sm:$0xff]   ;;  %v4911_v25 = vld [vmem:[#allocation6 + $0x4ec] ss:$24 sps:$4 sm:$0xff]  }
 0x327   :  { %3530 = vmatprep.subr.bf16.mxu0 %v4827_v51  ;;  %3573 = vmatprep.subr.bf16.mxu1 %v4830_v46  ;;  %v4914_v51 = vld [vmem:[#allocation6 + $0x7ec] ss:$24 sps:$4 sm:$0xff]   ;;  %v4909_v46 = vld [vmem:[#allocation6 + $0x4e8] ss:$24 sps:$4 sm:$0xff]  }
 0x32a   :  { %3531 = vmatpush2.bf16.msra.mxu0 %v4825_v14  ;;  %3574 = vmatpush2.bf16.msra.mxu1 %v4828_v38  ;;  %v4912_v14 = vld [vmem:[#allocation6 + $0x7e8] ss:$24 sps:$4 sm:$0xff]   ;;  %v4917_v38 = vld [vmem:[#allocation6 + $0x4bc] ss:$24 sps:$4 sm:$0xff]  }
 0x32b   :  { %3586 = vmatprep.subr.bf16.mxu0 %v4833_v27  ;;  %3629 = vmatprep.subr.bf16.mxu1 %v4836_v33  ;;  %v4920_v27 = vld [vmem:[#allocation6 + $0x7bc] ss:$24 sps:$4 sm:$0xff]   ;;  %v4915_v33 = vld [vmem:[#allocation6 + $0x4b8] ss:$24 sps:$4 sm:$0xff]  }
 0x32d   :  { %3533 = vmatmul.mubr.bf16.vlgmr.msra.gmra.mxu0 %v5335_v35  ;;  %3576 = vmatmul.mubr.bf16.vlgmr.msra.gmra.mxu1 %v5330_v41 }
 0x32e   :  { %3587 = vmatpush1.bf16.msra.mxu0 %v4831_v42  ;;  %3618 = vmatprep.mubr.bf16.mxu0 %v5328_v28  ;;  %v4918_v42 = vld [vmem:[#allocation6 + $0x7b8] ss:$24 sps:$4 sm:$0xff]  }
 0x32f   :  { %3630 = vmatpush1.bf16.msra.mxu1 %v4834_v43  ;;  %3661 = vmatprep.mubr.bf16.mxu1 %v5341_v22  ;;  %v4923_v43 = vld [vmem:[#allocation6 + $0x48c] ss:$24 sps:$4 sm:$0xff]  }
 0x330   :  { %3588 = vmatprep.subr.bf16.mxu0 %v4839_v44  ;;  %3631 = vmatprep.subr.bf16.mxu1 %v4842_v45  ;;  %v4926_v44 = vld [vmem:[#allocation6 + $0x78c] ss:$24 sps:$4 sm:$0xff]   ;;  %v4921_v45 = vld [vmem:[#allocation6 + $0x488] ss:$24 sps:$4 sm:$0xff]  }
 0x332   :  { %3589 = vmatpush1.bf16.msra.mxu0 %v4837_v48  ;;  %v4924_v48 = vld [vmem:[#allocation6 + $0x788] ss:$24 sps:$4 sm:$0xff]  }
 0x333   :  { %3632 = vmatpush1.bf16.msra.mxu1 %v4840_v49  ;;  %3590 = vmatprep.subr.bf16.mxu0 %v4845_v13  ;;  %v4929_v49 = vld [vmem:[#allocation6 + $0x164] ss:$24 sps:$4 sm:$0xff]  }
 0x334   :  { %3633 = vmatprep.subr.bf16.mxu1 %v4848_v50  ;;  %v4932_v13 = vld [vmem:[#allocation6 + $0x464] ss:$24 sps:$4 sm:$0xff]   ;;  %v4927_v50 = vld [vmem:[#allocation6 + $0x160] ss:$24 sps:$4 sm:$0xff]  }
 0x336   :  { %3591 = vmatpush1.bf16.msra.mxu0 %v4843_v52  ;;  %v4930_v52 = vld [vmem:[#allocation6 + $0x460] ss:$24 sps:$4 sm:$0xff]  }
 0x337   :  { %3634 = vmatpush1.bf16.msra.mxu1 %v4846_v53  ;;  %3592 = vmatprep.subr.bf16.mxu0 %v4851_v54  ;;  %v4935_v53 = vld [vmem:[#allocation6 + $0x134] ss:$24 sps:$4 sm:$0xff]  }
 0x338   :  { %3635 = vmatprep.subr.bf16.mxu1 %v4854_v55  ;;  %v4938_v54 = vld [vmem:[#allocation6 + $0x434] ss:$24 sps:$4 sm:$0xff]   ;;  %v4933_v55 = vld [vmem:[#allocation6 + $0x130] ss:$24 sps:$4 sm:$0xff]  }
 0x33a   :  { %3593 = vmatpush1.bf16.msra.mxu0 %v4849_v56  ;;  %v4936_v56 = vld [vmem:[#allocation6 + $0x430] ss:$24 sps:$4 sm:$0xff]  }
 0x33b   :  { %3636 = vmatpush1.bf16.msra.mxu1 %v4852_v57  ;;  %3594 = vmatprep.subr.bf16.mxu0 %v4857_v58  ;;  %v4941_v57 = vld [vmem:[#allocation6 + $0x104] ss:$24 sps:$4 sm:$0xff]  }
 0x33c   :  { %3637 = vmatprep.subr.bf16.mxu1 %v4860_v62  ;;  %v4944_v58 = vld [vmem:[#allocation6 + $0x404] ss:$24 sps:$4 sm:$0xff]   ;;  %v4939_v62 = vld [vmem:[#allocation6 + $0x100] ss:$24 sps:$4 sm:$0xff]  }
 0x33e   :  { %3595 = vmatpush1.bf16.msra.mxu0 %v4855_v63  ;;  %v4942_v63 = vld [vmem:[#allocation6 + $0x400] ss:$24 sps:$4 sm:$0xff]  }
 0x33f   :  { %3638 = vmatpush1.bf16.msra.mxu1 %v4858_v1  ;;  %3596 = vmatprep.subr.bf16.mxu0 %v4863_v4  ;;  %v4947_v1 = vld [vmem:[#allocation6 + $0xd4] ss:$24 sps:$4 sm:$0xff]  }
 0x340   :  { %3639 = vmatprep.subr.bf16.mxu1 %v4866_v5  ;;  %v4950_v4 = vld [vmem:[#allocation6 + $0x3d4] ss:$24 sps:$4 sm:$0xff]   ;;  %v4945_v5 = vld [vmem:[#allocation6 + $0xd0] ss:$24 sps:$4 sm:$0xff]  }
 0x342   :  { %3597 = vmatpush1.bf16.msra.mxu0 %v4861_v6  ;;  %v4953_v6 = vld [vmem:[#allocation6 + $0xa4] ss:$24 sps:$4 sm:$0xff]  }
 0x343   :  { %3640 = vmatpush1.bf16.msra.mxu1 %v4864_v7  ;;  %3598 = vmatprep.subr.bf16.mxu0 %v4869_v8  ;;  %v4956_v7 = vld [vmem:[#allocation6 + $0x3a4] ss:$24 sps:$4 sm:$0xff]   ;;  %v4954_v8 = vld [vmem:[#allocation6 + $0x3a0] ss:$24 sps:$4 sm:$0xff]  }
 0x344   :  { %3641 = vmatprep.subr.bf16.mxu1 %v4872_v9  ;;  %v4959_v9 = vld [vmem:[#allocation6 + $0x74] ss:$24 sps:$4 sm:$0xff]  }
 0x346   :  { %3599 = vmatpush1.bf16.msra.mxu0 %v4867_v10  ;;  %v4962_v10 = vld [vmem:[#allocation6 + $0x374] ss:$24 sps:$4 sm:$0xff]  }
 0x347   :  { %3642 = vmatpush1.bf16.msra.mxu1 %v4870_v11  ;;  %3600 = vmatprep.subr.bf16.mxu0 %v4875_v12  ;;  %v4957_v11 = vld [vmem:[#allocation6 + $0x70] ss:$24 sps:$4 sm:$0xff]  }
 0x348   :  { %3643 = vmatprep.subr.bf16.mxu1 %v4878_v15  ;;  %v4960_v12 = vld [vmem:[#allocation6 + $0x370] ss:$24 sps:$4 sm:$0xff]   ;;  %v4965_v15 = vld [vmem:[#allocation6 + $0x44] ss:$24 sps:$4 sm:$0xff]  }
 0x34a   :  { %3601 = vmatpush1.bf16.msra.mxu0 %v4873_v18  ;;  %v4968_v18 = vld [vmem:[#allocation6 + $0x344] ss:$24 sps:$4 sm:$0xff]  }
 0x34b   :  { %3644 = vmatpush1.bf16.msra.mxu1 %v4876_v19  ;;  %3602 = vmatprep.subr.bf16.mxu0 %v4881_v20  ;;  %v4963_v19 = vld [vmem:[#allocation6 + $0x40] ss:$24 sps:$4 sm:$0xff]  }
 0x34c   :  { %3645 = vmatprep.subr.bf16.mxu1 %v4884_v26  ;;  %v4966_v20 = vld [vmem:[#allocation6 + $0x340] ss:$24 sps:$4 sm:$0xff]   ;;  %v4971_v26 = vld [vmem:[#allocation6 + $0x14] ss:$24 sps:$4 sm:$0xff]  }
 0x34e   :  { %3603 = vmatpush2.bf16.msra.mxu0 %v4879_v29  ;;  %v4974_v29 = vld [vmem:[#allocation6 + $0x314] ss:$24 sps:$4 sm:$0xff]  }
 0x34f   :  { %3646 = vmatpush2.bf16.msra.mxu1 %v4882_v30  ;;  %3604 = vmatprep.subr.bf16.mxu0 %v4887_v31  ;;  %v4969_v30 = vld [vmem:[#allocation6 + $0x10] ss:$24 sps:$4 sm:$0xff]  }
 0x350   :  { %3647 = vmatprep.subr.bf16.mxu1 %v4890_v47  ;;  %v4972_v31 = vld [vmem:[#allocation6 + $0x310] ss:$24 sps:$4 sm:$0xff]   ;;  %v4977_v47 = vld [vmem:[#allocation6 + $0x2e4] ss:$24 sps:$4 sm:$0xff]  }
 0x352   :  { %3605 = vmatpush2.bf16.msra.mxu0 %v4885_v32  ;;  %v4980_v32 = vld [vmem:[#allocation6 + $0x5e4] ss:$24 sps:$4 sm:$0xff]  }
 0x353   :  { %3648 = vmatpush2.bf16.msra.mxu1 %v4888_v17  ;;  %3606 = vmatprep.subr.bf16.mxu0 %v4893_v34  ;;  %v4975_v17 = vld [vmem:[#allocation6 + $0x2e0] ss:$24 sps:$4 sm:$0xff]  }
 0x354   :  { %3649 = vmatprep.subr.bf16.mxu1 %v4896_v2  ;;  %v4978_v34 = vld [vmem:[#allocation6 + $0x5e0] ss:$24 sps:$4 sm:$0xff]   ;;  %v4983_v2 = vld [vmem:[#allocation6 + $0x2b4] ss:$24 sps:$4 sm:$0xff]  }
 0x356   :  { %3607 = vmatpush2.bf16.msra.mxu0 %v4891_v61  ;;  %v4986_v61 = vld [vmem:[#allocation6 + $0x5b4] ss:$24 sps:$4 sm:$0xff]  }
 0x357   :  { %3650 = vmatpush2.bf16.msra.mxu1 %v4894_v3  ;;  %3608 = vmatprep.subr.bf16.mxu0 %v4899_v36  ;;  %v4981_v3 = vld [vmem:[#allocation6 + $0x2b0] ss:$24 sps:$4 sm:$0xff]  }
 0x358   :  { %3651 = vmatprep.subr.bf16.mxu1 %v4902_v37  ;;  %v4984_v36 = vld [vmem:[#allocation6 + $0x5b0] ss:$24 sps:$4 sm:$0xff]   ;;  %v4989_v37 = vld [vmem:[#allocation6 + $0x284] ss:$24 sps:$4 sm:$0xff]  }
 0x35a   :  { %3609 = vmatpush2.bf16.msra.mxu0 %v4897_v59  ;;  %v4992_v59 = vld [vmem:[#allocation6 + $0x584] ss:$24 sps:$4 sm:$0xff]  }
 0x35b   :  { %3652 = vmatpush2.bf16.msra.mxu1 %v4900_v16  ;;  %3610 = vmatprep.subr.bf16.mxu0 %v4905_v60  ;;  %v4987_v16 = vld [vmem:[#allocation6 + $0x280] ss:$24 sps:$4 sm:$0xff]  }
 0x35c   :  { %3653 = vmatprep.subr.bf16.mxu1 %v4908_v39  ;;  %v4990_v60 = vld [vmem:[#allocation6 + $0x580] ss:$24 sps:$4 sm:$0xff]   ;;  %v4995_v39 = vld [vmem:[#allocation6 + $0x254] ss:$24 sps:$4 sm:$0xff]  }
 0x35e   :  { %3611 = vmatpush2.bf16.msra.mxu0 %v4903_v24  ;;  %v4998_v24 = vld [vmem:[#allocation6 + $0x554] ss:$24 sps:$4 sm:$0xff]  }
 0x35f   :  { %3654 = vmatpush2.bf16.msra.mxu1 %v4906_v23  ;;  %3612 = vmatprep.subr.bf16.mxu0 %v4911_v25  ;;  %v4993_v23 = vld [vmem:[#allocation6 + $0x250] ss:$24 sps:$4 sm:$0xff]  }
 0x360   :  { %3655 = vmatprep.subr.bf16.mxu1 %v4914_v51  ;;  %v4996_v25 = vld [vmem:[#allocation6 + $0x550] ss:$24 sps:$4 sm:$0xff]   ;;  %v5001_v51 = vld [vmem:[#allocation6 + $0x224] ss:$24 sps:$4 sm:$0xff]  }
 0x362   :  { %3613 = vmatpush2.bf16.msra.mxu0 %v4909_v46  ;;  %v5004_v46 = vld [vmem:[#allocation6 + $0x524] ss:$24 sps:$4 sm:$0xff]  }
 0x363   :  { %3656 = vmatpush2.bf16.msra.mxu1 %v4912_v14  ;;  %3614 = vmatprep.subr.bf16.mxu0 %v4917_v38  ;;  %v4999_v14 = vld [vmem:[#allocation6 + $0x220] ss:$24 sps:$4 sm:$0xff]  }
 0x364   :  { %3657 = vmatprep.subr.bf16.mxu1 %v4920_v27  ;;  %v5002_v38 = vld [vmem:[#allocation6 + $0x520] ss:$24 sps:$4 sm:$0xff]   ;;  %v5007_v27 = vld [vmem:[#allocation6 + $0x1f4] ss:$24 sps:$4 sm:$0xff]  }
 0x366   :  { %3615 = vmatpush2.bf16.msra.mxu0 %v4915_v33  ;;  %v5010_v33 = vld [vmem:[#allocation6 + $0x4f4] ss:$24 sps:$4 sm:$0xff]  }
 0x367   :  { %3658 = vmatpush2.bf16.msra.mxu1 %v4918_v42  ;;  %3616 = vmatprep.subr.bf16.mxu0 %v4923_v43  ;;  %v5005_v42 = vld [vmem:[#allocation6 + $0x1f0] ss:$24 sps:$4 sm:$0xff]  }
 0x368   :  { %3659 = vmatprep.subr.bf16.mxu1 %v4926_v44  ;;  %v5008_v43 = vld [vmem:[#allocation6 + $0x4f0] ss:$24 sps:$4 sm:$0xff]   ;;  %v5013_v44 = vld [vmem:[#allocation6 + $0x1c4] ss:$24 sps:$4 sm:$0xff]  }
 0x36a   :  { %3617 = vmatpush2.bf16.msra.mxu0 %v4921_v45  ;;  %v5016_v45 = vld [vmem:[#allocation6 + $0x4c4] ss:$24 sps:$4 sm:$0xff]  }
 0x36b   :  { %3660 = vmatpush2.bf16.msra.mxu1 %v4924_v48  ;;  %3672 = vmatprep.subr.bf16.mxu0 %v4929_v49  ;;  %v5011_v48 = vld [vmem:[#allocation6 + $0x1c0] ss:$24 sps:$4 sm:$0xff]  }
 0x36c   :  { %3715 = vmatprep.subr.bf16.mxu1 %v4932_v13  ;;  %v5014_v49 = vld [vmem:[#allocation6 + $0x4c0] ss:$24 sps:$4 sm:$0xff]   ;;  %v5019_v13 = vld [vmem:[#allocation6 + $0x194] ss:$24 sps:$4 sm:$0xff]  }
 0x36d   :  { %3619 = vmatmul.mubr.bf16.vlgmr.msra.gmra.mxu0 %v5332_v0 }
 0x36e   :  { %3662 = vmatmul.mubr.bf16.vlgmr.msra.gmra.mxu1 %v5335_v35  ;;  %3673 = vmatpush1.bf16.msra.mxu0 %v4927_v50  ;;  %v5022_v50 = vld [vmem:[#allocation6 + $0x494] ss:$24 sps:$4 sm:$0xff]  }
 0x36f   :  { %3704 = vmatprep.mubr.bf16.mxu0 %v5326_v40  ;;  %3716 = vmatpush1.bf16.msra.mxu1 %v4930_v52  ;;  %v4948_v40 = vld [vmem:[#allocation6 + $0x3d0] ss:$24 sps:$4 sm:$0xff]  }
 0x370   :  { %3747 = vmatprep.mubr.bf16.mxu1 %v5328_v28  ;;  %3674 = vmatprep.subr.bf16.mxu0 %v4935_v53  ;;  %v4951_v28 = vld [vmem:[#allocation6 + $0xa0] ss:$24 sps:$4 sm:$0xff]   ;;  %v5017_v52 = vld [vmem:[#allocation6 + $0x190] ss:$24 sps:$4 sm:$0xff]  }
 0x371   :  { %3717 = vmatprep.subr.bf16.mxu1 %v4938_v54  ;;  %v5020_v53 = vld [vmem:[#allocation6 + $0x490] ss:$24 sps:$4 sm:$0xff]   ;;  %v5025_v54 = vld [vmem:[#allocation6 + $0x764] ss:$24 sps:$4 sm:$0xff]  }
 0x372   :  { %3675 = vmatpush1.bf16.msra.mxu0 %v4933_v55  ;;  %v5023_v55 = vld [vmem:[#allocation6 + $0x760] ss:$24 sps:$4 sm:$0xff]  }
 0x373   :  { %3718 = vmatpush1.bf16.msra.mxu1 %v4936_v56  ;;  %3676 = vmatprep.subr.bf16.mxu0 %v4941_v57  ;;  %v5028_v56 = vld [vmem:[#allocation6 + $0x734] ss:$24 sps:$4 sm:$0xff]   ;;  %v5026_v57 = vld [vmem:[#allocation6 + $0x730] ss:$24 sps:$4 sm:$0xff]  }
 0x374   :  { %3719 = vmatprep.subr.bf16.mxu1 %v4944_v58  ;;  %v5031_v58 = vld [vmem:[#allocation6 + $0x704] ss:$24 sps:$4 sm:$0xff]  }
 0x376   :  { %3677 = vmatpush1.bf16.msra.mxu0 %v4939_v62  ;;  %v5029_v62 = vld [vmem:[#allocation6 + $0x700] ss:$24 sps:$4 sm:$0xff]  }
 0x377   :  { %3720 = vmatpush1.bf16.msra.mxu1 %v4942_v63  ;;  %3678 = vmatprep.subr.bf16.mxu0 %v4947_v1  ;;  %v5034_v63 = vld [vmem:[#allocation6 + $0x6d4] ss:$24 sps:$4 sm:$0xff]   ;;  %v5032_v1 = vld [vmem:[#allocation6 + $0x6d0] ss:$24 sps:$4 sm:$0xff]  }
 0x378   :  { %3721 = vmatprep.subr.bf16.mxu1 %v4950_v4  ;;  %v5037_v4 = vld [vmem:[#allocation6 + $0x6a4] ss:$24 sps:$4 sm:$0xff]  }
 0x37a   :  { %3679 = vmatpush1.bf16.msra.mxu0 %v4945_v5  ;;  %v5035_v5 = vld [vmem:[#allocation6 + $0x6a0] ss:$24 sps:$4 sm:$0xff]  }
 0x37b   :  { %3722 = vmatpush1.bf16.msra.mxu1 %v4948_v40  ;;  %3680 = vmatprep.subr.bf16.mxu0 %v4953_v6  ;;  %v5043_v40 = vld [vmem:[#allocation6 + $0x644] ss:$24 sps:$4 sm:$0xff]   ;;  %v5046_v6 = vld [vmem:[#allocation6 + $0x614] ss:$24 sps:$4 sm:$0xff]  }
 0x37c   :  { %3723 = vmatprep.subr.bf16.mxu1 %v4956_v7  ;;  %v5044_v7 = vld [vmem:[#allocation6 + $0x610] ss:$24 sps:$4 sm:$0xff]  }
 0x37e   :  { %3681 = vmatpush1.bf16.msra.mxu0 %v4951_v28  ;;  %v5049_v28 = vld [vmem:[#allocation6 + $0x8e4] ss:$24 sps:$4 sm:$0xff]  }
 0x37f   :  { %3724 = vmatpush1.bf16.msra.mxu1 %v4954_v8  ;;  %3682 = vmatprep.subr.bf16.mxu0 %v4959_v9  ;;  %v5047_v8 = vld [vmem:[#allocation6 + $0x8e0] ss:$24 sps:$4 sm:$0xff]   ;;  %v5052_v9 = vld [vmem:[#allocation6 + $0x8b4] ss:$24 sps:$4 sm:$0xff]  }
 0x380   :  { %3725 = vmatprep.subr.bf16.mxu1 %v4962_v10  ;;  %v5050_v10 = vld [vmem:[#allocation6 + $0x8b0] ss:$24 sps:$4 sm:$0xff]  }
 0x382   :  { %3683 = vmatpush1.bf16.msra.mxu0 %v4957_v11  ;;  %v5055_v11 = vld [vmem:[#allocation6 + $0x884] ss:$24 sps:$4 sm:$0xff]  }
 0x383   :  { %3726 = vmatpush1.bf16.msra.mxu1 %v4960_v12  ;;  %3684 = vmatprep.subr.bf16.mxu0 %v4965_v15  ;;  %v5053_v12 = vld [vmem:[#allocation6 + $0x880] ss:$24 sps:$4 sm:$0xff]   ;;  %v5058_v15 = vld [vmem:[#allocation6 + $0x854] ss:$24 sps:$4 sm:$0xff]  }
 0x384   :  { %3727 = vmatprep.subr.bf16.mxu1 %v4968_v18  ;;  %v5056_v18 = vld [vmem:[#allocation6 + $0x850] ss:$24 sps:$4 sm:$0xff]  }
 0x386   :  { %3685 = vmatpush1.bf16.msra.mxu0 %v4963_v19  ;;  %v5061_v19 = vld [vmem:[#allocation6 + $0x824] ss:$24 sps:$4 sm:$0xff]  }
 0x387   :  { %3728 = vmatpush1.bf16.msra.mxu1 %v4966_v20  ;;  %3686 = vmatprep.subr.bf16.mxu0 %v4971_v26  ;;  %v5059_v20 = vld [vmem:[#allocation6 + $0x820] ss:$24 sps:$4 sm:$0xff]   ;;  %v5064_v26 = vld [vmem:[#allocation6 + $0x7f4] ss:$24 sps:$4 sm:$0xff]  }
 0x388   :  { %3729 = vmatprep.subr.bf16.mxu1 %v4974_v29  ;;  %v5357_v29 = vsub.s32 1, %v5213_v21 }
 0x38a   :  { %3687 = vmatpush1.bf16.msra.mxu0 %v4969_v30  ;;  %v1926_v30 = vsub.s32 3, %v5213_v21 }
 0x38b   :  { %3730 = vmatpush1.bf16.msra.mxu1 %v4972_v31  ;;  %3688 = vmatprep.subr.bf16.mxu0 %v4977_v47  ;;  %v5062_v31 = vld [vmem:[#allocation6 + $0x7f0] ss:$24 sps:$4 sm:$0xff]  }
 0x38c   :  { %3731 = vmatprep.subr.bf16.mxu1 %v4980_v32  ;;  %v5067_v32 = vld [vmem:[#allocation6 + $0x7c4] ss:$24 sps:$4 sm:$0xff]  }
 0x38e   :  { %3689 = vmatpush2.bf16.msra.mxu0 %v4975_v17  ;;  %v5075_v17 = vld [vmem:[#allocation4] sm:$0xff] }
 0x38f   :  { %3732 = vmatpush2.bf16.msra.mxu1 %v4978_v34  ;;  %3690 = vmatprep.subr.bf16.mxu0 %v4983_v2  ;;  %v1923_v34 = vrot.slane %v5075_v17, %v5357_v29  ;;  %v1927_v2 = vrot.slane %v5075_v17, %v1926_v30 }
 0x390   :  { %3733 = vmatprep.subr.bf16.mxu1 %v4986_v61  ;;  %v5065_v61 = vld [vmem:[#allocation6 + $0x7c0] ss:$24 sps:$4 sm:$0xff]  }
 0x392   :  { %3691 = vmatpush2.bf16.msra.mxu0 %v4981_v3 }
 0x393   :  { %3734 = vmatpush2.bf16.msra.mxu1 %v4984_v36  ;;  %3692 = vmatprep.subr.bf16.mxu0 %v4989_v37  ;;  %v5070_v36 = vld [vmem:[#allocation6 + $0x794] ss:$24 sps:$4 sm:$0xff]  }
 0x394   :  { %3735 = vmatprep.subr.bf16.mxu1 %v4992_v59  ;;  %v1953_v59 = vrot.slane %v1923_v34, %v5357_v29 }
 0x396   :  { %3693 = vmatpush2.bf16.msra.mxu0 %v4987_v16  ;;  %v1957_v16 = vrot.slane %v1927_v2, %v5357_v29 }
 0x397   :  { %3736 = vmatpush2.bf16.msra.mxu1 %v4990_v60  ;;  %3694 = vmatprep.subr.bf16.mxu0 %v4995_v39  ;;  %v5068_v60 = vld [vmem:[#allocation6 + $0x790] ss:$24 sps:$4 sm:$0xff]  }
 0x398   :  { %3737 = vmatprep.subr.bf16.mxu1 %v4998_v24 }
 0x39a   :  { %3695 = vmatpush2.bf16.msra.mxu0 %v4993_v23 }
 0x39b   :  { %3738 = vmatpush2.bf16.msra.mxu1 %v4996_v25  ;;  %3696 = vmatprep.subr.bf16.mxu0 %v5001_v51 }
 0x39c   :  { %3739 = vmatprep.subr.bf16.mxu1 %v5004_v46 }
 0x39e   :  { %3697 = vmatpush2.bf16.msra.mxu0 %v4999_v14 }
 0x39f   :  { %3740 = vmatpush2.bf16.msra.mxu1 %v5002_v38  ;;  %3698 = vmatprep.subr.bf16.mxu0 %v5007_v27 }
 0x3a0   :  { %3741 = vmatprep.subr.bf16.mxu1 %v5010_v33 }
 0x3a2   :  { %3699 = vmatpush2.bf16.msra.mxu0 %v5005_v42 }
 0x3a3   :  { %3742 = vmatpush2.bf16.msra.mxu1 %v5008_v43  ;;  %3700 = vmatprep.subr.bf16.mxu0 %v5013_v44 }
 0x3a4   :  { %3743 = vmatprep.subr.bf16.mxu1 %v5016_v45 }
 0x3a6   :  { %3701 = vmatpush2.bf16.msra.mxu0 %v5011_v48 }
 0x3a7   :  { %3744 = vmatpush2.bf16.msra.mxu1 %v5014_v49  ;;  %3702 = vmatprep.subr.bf16.mxu0 %v5019_v13 }
 0x3a8   :  { %3745 = vmatprep.subr.bf16.mxu1 %v5022_v50 }
 0x3aa   :  { %3703 = vmatpush2.bf16.msra.mxu0 %v5017_v52 }
 0x3ab   :  { %3746 = vmatpush2.bf16.msra.mxu1 %v5020_v53  ;;  %3758 = vmatprep.subr.bf16.mxu0 %v5025_v54 }
 0x3ad   :  { %3705 = vmatmul.mubr.bf16.vlgmr.msra.gmra.mxu0 %v5330_v41  ;;  %v5040_v41 = vld [vmem:[#allocation6 + $0x674] ss:$24 sps:$4 sm:$0xff]   ;;  %v3448_v47 = vpop.f32.mrf.mxu0  ;;  %v3491_v37 = vpop.f32.mrf.mxu1 }
 0x3ae   :  { %3748 = vmatmul.mubr.bf16.vlgmr.msra.gmra.mxu1 %v5332_v0  ;;  %3759 = vmatpush1.bf16.msra.mxu0 %v5023_v55  ;;  %v5038_v0 = vld [vmem:[#allocation6 + $0x670] ss:$24 sps:$4 sm:$0xff]   ;;  %v3449_v23 = vadd.f32 %v3448_v47, %v1953_v59 }
 0x3af   :  { %3790 = vmatprep.mubr.bf16.mxu0 %v5341_v22  ;;  %3760 = vmatprep.subr.bf16.mxu0 %v5028_v56  ;;  %v5041_v22 = vld [vmem:[#allocation6 + $0x640] ss:$24 sps:$4 sm:$0xff]   ;;  %v3450_v3 = vpop.f32.mrf.mxu0  ;;  %v3493_v24 = vpop.f32.mrf.mxu1  ;;  %v1930_v56 = vsub.s32 5, %v5213_v21 }
 0x3b0   :  { %v3451_v25 = vadd.f32 %v3450_v3, %v1957_v16  ;;  %v3492_v38 = vadd.f32 %v3491_v37, %v3449_v23 }
 0x3b1   :  { %v3452_v39 = vpop.f32.mrf.mxu0  ;;  %v3495_v46 = vpop.f32.mrf.mxu1 }
 0x3b2   :  { %3761 = vmatpush1.bf16.msra.mxu0 %v5026_v57  ;;  %v3494_v27 = vadd.f32 %v3493_v24, %v3451_v25  ;;  %v3453_v33 = vadd.f32 %v3452_v39, %v1953_v59 }
 0x3b3   :  { %3762 = vmatprep.subr.bf16.mxu0 %v5031_v58  ;;  %v3454_v51 = vpop.f32.mrf.mxu0  ;;  %v3497_v48 = vpop.f32.mrf.mxu1  ;;  %v1934_v58 = vsub.s32 7, %v5213_v21 }
 0x3b4   :  { %v3455_v42 = vadd.f32 %v3454_v51, %v1957_v16  ;;  %v3496_v13 = vadd.f32 %v3495_v46, %v3453_v33 }
 0x3b6   :  { %3763 = vmatpush1.bf16.msra.mxu0 %v5029_v62  ;;  %v3498_v50 = vadd.f32 %v3497_v48, %v3455_v42  ;;  %v1931_v62 = vrot.slane %v5075_v17, %v1930_v56 }
 0x3b7   :  { %3764 = vmatprep.subr.bf16.mxu0 %v5034_v63 }
 0x3ba   :  { %3765 = vmatpush1.bf16.msra.mxu0 %v5032_v1  ;;  %v1935_v1 = vrot.slane %v5075_v17, %v1934_v58 }
 0x3bb   :  { %3766 = vmatprep.subr.bf16.mxu0 %v5037_v4  ;;  %v1961_v4 = vrot.slane %v1931_v62, %v5357_v29 }
 0x3be   :  { %3767 = vmatpush1.bf16.msra.mxu0 %v5035_v5 }
 0x3bf   :  { %3768 = vmatprep.subr.bf16.mxu0 %v5040_v41  ;;  %v1965_v41 = vrot.slane %v1935_v1, %v5357_v29 }
 0x3c2   :  { %3769 = vmatpush1.bf16.msra.mxu0 %v5038_v0 }
 0x3c3   :  { %3770 = vmatprep.subr.bf16.mxu0 %v5043_v40 }
 0x3c6   :  { %3771 = vmatpush1.bf16.msra.mxu0 %v5041_v22 }
 0x3c7   :  { %3772 = vmatprep.subr.bf16.mxu0 %v5046_v6 }
 0x3ca   :  { %3773 = vmatpush1.bf16.msra.mxu0 %v5044_v7 }
 0x3cb   :  { %3774 = vmatprep.subr.bf16.mxu0 %v5049_v28 }
 0x3ce   :  { %3775 = vmatpush2.bf16.msra.mxu0 %v5047_v8 }
 0x3cf   :  { %3776 = vmatprep.subr.bf16.mxu0 %v5052_v9 }
 0x3d2   :  { %3777 = vmatpush2.bf16.msra.mxu0 %v5050_v10 }
 0x3d3   :  { %3778 = vmatprep.subr.bf16.mxu0 %v5055_v11 }
 0x3d6   :  { %3779 = vmatpush2.bf16.msra.mxu0 %v5053_v12 }
 0x3d7   :  { %3780 = vmatprep.subr.bf16.mxu0 %v5058_v15 }
 0x3da   :  { %3781 = vmatpush2.bf16.msra.mxu0 %v5056_v18 }
 0x3db   :  { %3782 = vmatprep.subr.bf16.mxu0 %v5061_v19 }
 0x3de   :  { %3783 = vmatpush2.bf16.msra.mxu0 %v5059_v20 }
 0x3df   :  { %3784 = vmatprep.subr.bf16.mxu0 %v5064_v26 }
 0x3e2   :  { %3785 = vmatpush2.bf16.msra.mxu0 %v5062_v31 }
 0x3e3   :  { %3786 = vmatprep.subr.bf16.mxu0 %v5067_v32 }
 0x3e6   :  { %3787 = vmatpush2.bf16.msra.mxu0 %v5065_v61 }
 0x3e7   :  { %3788 = vmatprep.subr.bf16.mxu0 %v5070_v36  ;;  %v5076_v36 = vld [vmem:[#allocation4 + $0x8] sm:$0xf] }
 0x3e8   :  { %v1939_v37 = vrot.slane %v5076_v36, %v5357_v29  ;;  %v1943_v59 = vrot.slane %v5076_v36, %v1926_v30 }
 0x3ea   :  { %3789 = vmatpush2.bf16.msra.mxu0 %v5068_v60  ;;  %v1969_v39 = vrot.slane %v1939_v37, %v5357_v29  ;;  %v1973_v24 = vrot.slane %v1943_v59, %v5357_v29 }
 0x3ed   :  { %v3534_v14 = vpop.f32.mrf.mxu0  ;;  %3791 = vmatmul.mubr.bf16.vlgmr.msra.gmra.mxu0 %v5335_v35  ;;  %v3577_v57 = vpop.f32.mrf.mxu1 }
 0x3ee   :  { %v3535_v44 = vadd.f32 %v3534_v14, %v3492_v38  ;;  %v3578_v0 = vadd.f32 %v3577_v57, %v1961_v4 }
 0x3ef   :  { %v3536_v43 = vpop.f32.mrf.mxu0  ;;  %v3579_v63 = vpop.f32.mrf.mxu1 }
 0x3f0   :  { %v3537_v45 = vadd.f32 %v3536_v43, %v3494_v27  ;;  %v3580_v6 = vadd.f32 %v3579_v63, %v1965_v41 }
 0x3f1   :  { %v3538_v49 = vpop.f32.mrf.mxu0  ;;  %v3581_v5 = vpop.f32.mrf.mxu1 }
 0x3f2   :  { %v4339_v52 = vpack.c.bf16 %v3537_v45, %v3535_v44  ;;  %v3539_v54 = vadd.f32 %v3538_v49, %v3496_v13  ;;  %v3582_v9 = vadd.f32 %v3581_v5, %v1961_v4 }
 0x3f3   :  { %v3540_v53 = vpop.f32.mrf.mxu0  ;;  %v3583_v40 = vpop.f32.mrf.mxu1 }
 0x3f4   :  { %3837 = vst [vmem:[%s5397_s4] sm:$0xff] %v4339_v52  ;;  %v3541_v55 = vadd.f32 %v3540_v53, %v3498_v50  ;;  %v3584_v15 = vadd.f32 %v3583_v40, %v1965_v41 }
 0x3f6   :  { %v4342_v35 = vpack.c.bf16 %v3541_v55, %v3539_v54 }
 0x3f8   :  { %3840 = vst [vmem:[%s5397_s4 + $0x18] sm:$0xff] %v4342_v35 }
 0x42d   :  { %v3620_v22 = vpop.f32.mrf.mxu0 }
 0x42e   :  { %v3621_v7 = vadd.f32 %v3620_v22, %v3578_v0  ;;  %v3663_v28 = vpop.f32.mrf.mxu1 }
 0x42f   :  { %v3622_v8 = vpop.f32.mrf.mxu0 }
 0x430   :  { %v3623_v10 = vadd.f32 %v3622_v8, %v3580_v6  ;;  %v3665_v11 = vpop.f32.mrf.mxu1  ;;  %v3664_v18 = vadd.f32 %v3663_v28, %v3621_v7 }
 0x431   :  { %v3624_v12 = vpop.f32.mrf.mxu0 }
 0x432   :  { %v3666_v19 = vadd.f32 %v3665_v11, %v3623_v10  ;;  %v3625_v20 = vadd.f32 %v3624_v12, %v3582_v9  ;;  %v3667_v26 = vpop.f32.mrf.mxu1 }
 0x433   :  { %v3626_v31 = vpop.f32.mrf.mxu0 }
 0x434   :  { %v4340_v47 = vpack.c.bf16 %v3666_v19, %v3664_v18  ;;  %v3627_v32 = vadd.f32 %v3626_v31, %v3584_v15  ;;  %v3669_v17 = vpop.f32.mrf.mxu1  ;;  %v3668_v34 = vadd.f32 %v3667_v26, %v3625_v20 }
 0x436   :  { %3838 = vst [vmem:[%s5397_s4 + $0x8] sm:$0xff] %v4340_v47  ;;  %v3670_v2 = vadd.f32 %v3669_v17, %v3627_v32 }
 0x438   :  { %v4343_v61 = vpack.c.bf16 %v3670_v2, %v3668_v34 }
 0x43a   :  { %3841 = vst [vmem:[%s5397_s4 + $0x20] sm:$0xff] %v4343_v61 }
 0x46d   :  { %v3706_v3 = vpop.f32.mrf.mxu0 }
 0x46e   :  { %v3749_v60 = vpop.f32.mrf.mxu1  ;;  %v3707_v51 = vadd.f32 %v3706_v3, %v1969_v39 }
 0x46f   :  { %v3708_v16 = vpop.f32.mrf.mxu0 }
 0x470   :  { %v3751_v25 = vpop.f32.mrf.mxu1  ;;  %v3709_v46 = vadd.f32 %v3708_v16, %v1973_v24  ;;  %v3750_v33 = vadd.f32 %v3749_v60, %v3707_v51 }
 0x471   :  { %v3710_v23 = vpop.f32.mrf.mxu0 }
 0x472   :  { %v3753_v38 = vpop.f32.mrf.mxu1  ;;  %v3752_v42 = vadd.f32 %v3751_v25, %v3709_v46  ;;  %v3711_v43 = vadd.f32 %v3710_v23, %v1969_v39 }
 0x473   :  { %v3712_v14 = vpop.f32.mrf.mxu0 }
 0x474   :  { %v3713_v44 = vadd.f32 %v3712_v14, %v1973_v24  ;;  %v3755_v48 = vpop.f32.mrf.mxu1  ;;  %v3754_v13 = vadd.f32 %v3753_v38, %v3711_v43 }
 0x476   :  { %v3756_v50 = vadd.f32 %v3755_v48, %v3713_v44 }
 0x4ad   :  { %v3792_v27 = vpop.f32.mrf.mxu0 }
 0x4ae   :  { %v3793_v21 = vadd.f32 %v3792_v27, %v3750_v33 }
 0x4af   :  { %v3794_v45 = vpop.f32.mrf.mxu0 }
 0x4b0   :  { %v3795_v30 = vadd.f32 %v3794_v45, %v3752_v42 }
 0x4b1   :  { %v3796_v49 = vpop.f32.mrf.mxu0 }
 0x4b2   :  { %v4341_v52 = vpack.c.bf16 %v3795_v30, %v3793_v21  ;;  %v3797_v53 = vadd.f32 %v3796_v49, %v3754_v13 }
 0x4b3   :  { %v3798_v29 = vpop.f32.mrf.mxu0 }
 0x4b4   :  { %3839 = vst [vmem:[%s5397_s4 + $0x10] sm:$0xff] %v4341_v52  ;;  %v3799_v54 = vadd.f32 %v3798_v29, %v3756_v50 }
 0x4b6   :  { %v4344_v55 = vpack.c.bf16 %v3799_v54, %v3797_v53 }
 0x4b8   :  { %3842 = vst [vmem:[%s5397_s4 + $0x28] sm:$0xff] %v4344_v55 }
 0x4b9   :  { %3847 = vsyncpa [#allocation3], 1 }
 0x4ba   :  { %3848 = vsyncpa [#allocation5], 1 }

</bundles_post_ra>
